<compile_context>
chip_gen: v6e
topology: v6e:2x2x1
jax: 0.10.0
libtpu: 0.0.40
codegen_flags: <defaults>
</compile_context>

<pallas_src>
import functools

import jax
import jax.numpy as jnp
from jax import lax
from jax.experimental import pallas as pl
from jax.experimental.pallas import tpu as pltpu

FW = 8  # feature width seen by the kernels (= widest layer; 4/2-wide padded to 8)


def _round_up(x, m):
    return (x + m - 1) // m * m


def _pad2d(x, rows, cols, dtype=jnp.float32):
    out = jnp.zeros((rows, cols), dtype)
    return out.at[: x.shape[0], : x.shape[1]].set(x.astype(dtype))


# ---------------------------------------------------------------------------
# Prepass: one tiled read of the f32 adjacency ->
#   * exact int8 0/1 copy, zero-padded to [n_pad, n_pad]
#   * in-degree per dst row (f32 [n_pad, 1]) via accumulate-into-output
# Ragged edge blocks of the unpadded input are masked in-kernel.
# ---------------------------------------------------------------------------
def prep_kernel(a_ref, a8_ref, din_ref, *, n):
    i = pl.program_id(0)
    k = pl.program_id(1)
    tm, tk = a_ref.shape
    rows = lax.broadcasted_iota(jnp.int32, (tm, tk), 0) + i * tm
    cols = lax.broadcasted_iota(jnp.int32, (tm, tk), 1) + k * tk
    a = jnp.where((rows < n) & (cols < n), a_ref[...], 0.0)

    a8_ref[...] = a.astype(jnp.int8)  # values are exactly 0/1

    @pl.when(k == 0)
    def _():
        din_ref[...] = jnp.zeros_like(din_ref)

    din_ref[...] += jnp.sum(a, axis=1, keepdims=True)


def _prep_pass(adj, *, n_pad, tile):
    n = adj.shape[0]
    if tile > n:
        # Degenerate small-N case: a (tile, tile) block would exceed the array;
        # pad in XLA (tiny here) rather than rely on block > dim raggedness.
        adj = jnp.zeros((n_pad, n_pad), adj.dtype).at[:n, :n].set(adj)
        n = n_pad
    grid = (n_pad // tile, n_pad // tile)
    return pl.pallas_call(
        functools.partial(prep_kernel, n=n),
        out_shape=(jax.ShapeDtypeStruct((n_pad, n_pad), jnp.int8),
                   jax.ShapeDtypeStruct((n_pad, 1), jnp.float32)),
        grid_spec=pltpu.PrefetchScalarGridSpec(
            num_scalar_prefetch=0,
            grid=grid,
            in_specs=[pl.BlockSpec((tile, tile), lambda i, k: (i, k))],
            out_specs=[pl.BlockSpec((tile, tile), lambda i, k: (i, k)),
                       pl.BlockSpec((tile, 1), lambda i, k: (i, 0))],
        ),
        compiler_params=pltpu.CompilerParams(
            dimension_semantics=("parallel", "arbitrary")),
    )(adj)


# ---------------------------------------------------------------------------
# One normalized graph-conv pass, tiled over (dst tiles, src tiles).
#   acc[i] += A[i, k] @ xw[k]   (int8 A upcast in-VMEM; f32 accumulate)
#   on last src tile:  out[i] = cpost[i] * ((cdst[i] * acc[i] + b) @ P + q)
# which fuses dst-normalization, bias and the next tiny feature matmul.
# ---------------------------------------------------------------------------
def gconv_kernel(a_ref, xw_ref, cdst_ref, b_ref, p_ref, q_ref, cpost_ref,
                 out_ref, acc_ref):
    k = pl.program_id(1)

    @pl.when(k == 0)
    def _():
        acc_ref[...] = jnp.zeros_like(acc_ref)

    # int8 -> f32 -> bf16 upcast (exact for 0/1): HBM stream stays 1 B/elem on
    # every chip generation while the MXU sees a plain bf16 matmul.
    a = a_ref[...].astype(jnp.float32).astype(jnp.bfloat16)
    acc_ref[...] += jnp.dot(a, xw_ref[...], preferred_element_type=jnp.float32)

    @pl.when(k == pl.num_programs(1) - 1)
    def _():
        h = cdst_ref[...] * acc_ref[...] + b_ref[...]          # [tm, FW] f32
        y = jnp.dot(h, p_ref[...],
                    preferred_element_type=jnp.float32) + q_ref[...]
        out_ref[...] = (cpost_ref[...] * y).astype(out_ref.dtype)


def _gconv_pass(a8, xw, c_dst, b, p, q, c_post, *, tile, out_dtype):
    n_pad = a8.shape[0]
    grid = (n_pad // tile, n_pad // tile)
    return pl.pallas_call(
        gconv_kernel,
        out_shape=jax.ShapeDtypeStruct((n_pad, FW), out_dtype),
        grid_spec=pltpu.PrefetchScalarGridSpec(
            num_scalar_prefetch=0,
            grid=grid,
            in_specs=[
                pl.BlockSpec((tile, tile), lambda i, k: (i, k)),  # A tile (int8)
                pl.BlockSpec((tile, FW), lambda i, k: (k, 0)),    # c_src-scaled XW
                pl.BlockSpec((tile, 1), lambda i, k: (i, 0)),     # c_dst column
                pl.BlockSpec((1, FW), lambda i, k: (0, 0)),       # layer bias
                pl.BlockSpec((FW, FW), lambda i, k: (0, 0)),      # epilogue W
                pl.BlockSpec((1, FW), lambda i, k: (0, 0)),       # epilogue bias
                pl.BlockSpec((tile, 1), lambda i, k: (i, 0)),     # post scale
            ],
            out_specs=pl.BlockSpec((tile, FW), lambda i, k: (i, 0)),
            scratch_shapes=[pltpu.VMEM((tile, FW), jnp.float32)],
        ),
        compiler_params=pltpu.CompilerParams(
            dimension_semantics=("parallel", "arbitrary")),
    )(a8, xw, c_dst, b, p, q, c_post)


@functools.partial(jax.jit, static_argnames=("tile",))
def test_forward(feat, adj, params, tile=None):
    """feat: [N, 10] f32, adj: [N, N] f32 (adj[dst, src]). Returns [N, 2] f32."""
    n = feat.shape[0]
    n_pad = _round_up(n, 128)
    if tile is None:
        # Largest tile in {1024,512,256,128} that divides n_pad while giving
        # >=2 dst tiles (so v7x's two TensorCores both get work); else 1 tile.
        tile = n_pad
        for t in (1024, 512, 256, 128):
            if n_pad % t == 0 and n_pad // t >= 2:
                tile = t
                break
    else:
        n_pad = _round_up(n_pad, tile)   # user-supplied tile must be a mult of 128

    w1, b1 = params["w1"], params["b1"]
    w2, b2 = params["w2"], params["b2"]
    w3, b3 = params["w3"], params["b3"]

    # One f32 read of A: int8 copy + in-degrees. Out-degrees from the int8 copy.
    a8, deg_in = _prep_pass(adj, n_pad=n_pad, tile=tile)
    deg_out = jnp.sum(a8, axis=0, dtype=jnp.float32)[:, None]      # [n_pad, 1]
    c_dst = lax.rsqrt(jnp.maximum(deg_in, 1.0))
    c_src = lax.rsqrt(jnp.maximum(deg_out, 1.0))

    zero_b = jnp.zeros((1, FW), jnp.float32)
    ones_p = jnp.ones((n_pad, 1), jnp.float32)

    # ---- pass 1: h1 = c_dst*(A @ (c_src * X W1)) + b1 ; epilogue emits
    #              g1 = c_src * (h1 @ W2) as the bf16 operand of pass 2.
    xw1 = (feat @ w1) * c_src[:n]                                  # tiny [N,10]@[10,8]
    g1 = _gconv_pass(
        a8,
        _pad2d(xw1, n_pad, FW, jnp.bfloat16),
        c_dst,
        _pad2d(b1, 1, FW),
        _pad2d(w2, FW, FW),
        zero_b,
        c_src,
        tile=tile,
        out_dtype=jnp.bfloat16,
    )

    # ---- pass 2: h2 = c_dst*(A @ g1) + b2 ; epilogue emits y = h2 @ W3 + b3.
    y = _gconv_pass(
        a8,
        g1,
        c_dst,
        _pad2d(b2, 1, FW),
        _pad2d(w3, FW, FW),
        _pad2d(b3, 1, FW),
        ones_p,
        tile=tile,
        out_dtype=jnp.float32,
    )
    return y[:n, :2]


def reference_forward(feat, adj, params):
    deg_in = jnp.sum(adj, axis=1, keepdims=True)
    deg_out = jnp.sum(adj, axis=0, keepdims=True)
    a_norm = adj * lax.rsqrt(jnp.maximum(deg_in, 1.0)) \
                 * lax.rsqrt(jnp.maximum(deg_out, 1.0))
    h1 = a_norm @ (feat @ params["w1"]) + params["b1"]
    h2 = a_norm @ (h1 @ params["w2"]) + params["b2"]
    return h2 @ params["w3"] + params["b3"]


def init_params(key):
    k1, k2, k3, k4, k5, k6 = jax.random.split(key, 6)
    # GraphConv weights stored [in, out]; Linear weight pre-transposed [4, 2].
    return {
        "w1": jax.random.normal(k1, (10, 8), jnp.float32) * 0.1,
        "b1": jax.random.normal(k2, (1, 8), jnp.float32) * 0.1,
        "w2": jax.random.normal(k3, (8, 4), jnp.float32) * 0.1,
        "b2": jax.random.normal(k4, (1, 4), jnp.float32) * 0.1,
        "w3": jax.random.normal(k5, (4, 2), jnp.float32) * 0.1,
        "b3": jax.random.normal(k6, (1, 2), jnp.float32) * 0.1,
    }


if __name__ == "__main__":
    key = jax.random.PRNGKey(0)
    k_feat, k_adj, k_params = jax.random.split(key, 3)
    params = init_params(k_params)

    # Primary small test (single-tile grid), matching the module's shapes.
    N = 16
    feat = jax.random.normal(k_feat, (N, 10), jnp.float32)
    adj = (jax.random.uniform(k_adj, (N, N)) < 0.3).astype(jnp.float32)  # adj[dst, src]

    y = jax.block_until_ready(test_forward(feat, adj, params))
    y_ref = reference_forward(feat, adj, params)
    assert y.shape == (N, 2)
    # bf16 activation stream -> tolerance looser than pure-f32 (A is exact int8).
    assert jnp.allclose(y, y_ref, atol=2e-2, rtol=2e-2), "mismatch vs reference (N=16)"

    # Secondary test: 2x2 tile grid, ragged prepass blocks, accumulation over
    # src tiles, zero padding of the int8 adjacency.
    N2 = 200
    k_feat2, k_adj2 = jax.random.split(jax.random.PRNGKey(1))
    feat2 = jax.random.normal(k_feat2, (N2, 10), jnp.float32)
    adj2 = (jax.random.uniform(k_adj2, (N2, N2)) < 0.05).astype(jnp.float32)

    y2 = jax.block_until_ready(test_forward(feat2, adj2, params, tile=128))
    y2_ref = reference_forward(feat2, adj2, params)
    assert y2.shape == (N2, 2)
    assert jnp.allclose(y2, y2_ref, atol=2e-2, rtol=2e-2), "mismatch vs reference (N=200)"

    print("KERNEL_OK")
</pallas_src>

<mosaic_0001>
module attributes {stable_mosaic.version = 11 : i64} {
  func.func @prep_kernel(%arg0: i32, %arg1: i32, %arg2: memref<128x128xf32, #tpu.memory_space<vmem>>, %arg3: memref<128x128xi8, #tpu.memory_space<vmem>>, %arg4: memref<128x1xf32, #tpu.memory_space<vmem>>) attributes {dimension_semantics = [#tpu.dimension_semantics<parallel>, #tpu.dimension_semantics<arbitrary>], iteration_bounds = array<i64: 1, 1>, scalar_prefetch = 0 : i64, scratch_operands = 0 : i64, tpu.core_type = #tpu.core_type<tc>, window_params = [{transform_indices = @transform_0, window_bounds = array<i64: 128, 128>}, {transform_indices = @transform_1, window_bounds = array<i64: 128, 128>}, {transform_indices = @transform_2, window_bounds = array<i64: 128, 1>}]} {
    %0 = tpu.iota {dimensions = array<i32: 0>} : vector<128x128xi32>
    %c128_i32 = arith.constant 128 : i32
    %1 = arith.muli %arg0, %c128_i32 : i32
    %2 = vector.broadcast %1 : i32 to vector<128x128xi32>
    %3 = arith.addi %0, %2 : vector<128x128xi32>
    %4 = tpu.iota {dimensions = array<i32: 1>} : vector<128x128xi32>
    %c128_i32_0 = arith.constant 128 : i32
    %5 = arith.muli %arg1, %c128_i32_0 : i32
    %6 = vector.broadcast %5 : i32 to vector<128x128xi32>
    %7 = arith.addi %4, %6 : vector<128x128xi32>
    %c128_i32_1 = arith.constant 128 : i32
    %8 = vector.broadcast %c128_i32_1 : i32 to vector<128x128xi32>
    %9 = arith.cmpi slt, %3, %8 : vector<128x128xi32>
    %c128_i32_2 = arith.constant 128 : i32
    %10 = vector.broadcast %c128_i32_2 : i32 to vector<128x128xi32>
    %11 = arith.cmpi slt, %7, %10 : vector<128x128xi32>
    %12 = arith.andi %9, %11 : vector<128x128xi1>
    %c0 = arith.constant 0 : index
    %c0_3 = arith.constant 0 : index
    %13 = vector.load %arg2[%c0, %c0_3] : memref<128x128xf32, #tpu.memory_space<vmem>>, vector<128x128xf32>
    %cst = arith.constant 0.000000e+00 : f32
    %14 = vector.broadcast %cst : f32 to vector<128x128xf32>
    %15 = arith.select %12, %13, %14 : vector<128x128xi1>, vector<128x128xf32>
    %16 = arith.fptosi %15 : vector<128x128xf32> to vector<128x128xi8>
    %c0_4 = arith.constant 0 : index
    %c0_5 = arith.constant 0 : index
    %17 = vector.load %arg3[%c0_4, %c0_5] : memref<128x128xi8, #tpu.memory_space<vmem>>, vector<128x128xi8>
    tpu.vector_store %arg3[%c0_4, %c0_5], %16 {strides = array<i32>} : memref<128x128xi8, #tpu.memory_space<vmem>>, vector<128x128xi8>,
    %c0_i32 = arith.constant 0 : i32
    %18 = arith.cmpi eq, %arg1, %c0_i32 : i32
    %19 = arith.extui %18 : i1 to i32
    %c0_i32_6 = arith.constant 0 : i32
    %20 = arith.cmpi ne, %19, %c0_i32_6 : i32
    scf.if %20 {
      %cst_12 = arith.constant 0.000000e+00 : f32
      %26 = vector.broadcast %cst_12 : f32 to vector<128x1xf32>
      %c0_13 = arith.constant 0 : index
      %c0_14 = arith.constant 0 : index
      %27 = vector.load %arg4[%c0_13, %c0_14] : memref<128x1xf32, #tpu.memory_space<vmem>>, vector<128x1xf32>
      tpu.vector_store %arg4[%c0_13, %c0_14], %26 {strides = array<i32>} : memref<128x1xf32, #tpu.memory_space<vmem>>, vector<128x1xf32>,
    } else {
    }
    %c0_7 = arith.constant 0 : index
    %c0_8 = arith.constant 0 : index
    %21 = vector.load %arg4[%c0_7, %c0_8] : memref<128x1xf32, #tpu.memory_space<vmem>>, vector<128x1xf32>
    %cst_9 = arith.constant dense<0.000000e+00> : vector<128xf32>
    %22 = vector.multi_reduction <add>, %15, %cst_9 [1] : vector<128x128xf32> to vector<128xf32>
    %23 = vector.shape_cast %22 : vector<128xf32> to vector<128x1xf32>
    %24 = arith.addf %21, %23 : vector<128x1xf32>
    %c0_10 = arith.constant 0 : index
    %c0_11 = arith.constant 0 : index
    %25 = vector.load %arg4[%c0_10, %c0_11] : memref<128x1xf32, #tpu.memory_space<vmem>>, vector<128x1xf32>
    tpu.vector_store %arg4[%c0_10, %c0_11], %24 {strides = array<i32>} : memref<128x1xf32, #tpu.memory_space<vmem>>, vector<128x1xf32>,
    return
  }
  func.func @transform_0(%arg0: i32, %arg1: i32) -> (i32, i32) {
    %c0_i32 = arith.constant 0 : i32
    return %arg0, %arg1 : i32, i32
  }
  func.func @transform_1(%arg0: i32, %arg1: i32) -> (i32, i32) {
    %c0_i32 = arith.constant 0 : i32
    return %arg0, %arg1 : i32, i32
  }
  func.func @transform_2(%arg0: i32, %arg1: i32) -> (i32, i32) {
    %c0_i32 = arith.constant 0 : i32
    %c0_i32_0 = arith.constant 0 : i32
    return %arg0, %c0_i32 : i32, i32
  }
}

module attributes {stable_mosaic.version = 11 : i64} {
  func.func @gconv_kernel(%arg0: i32, %arg1: i32, %arg2: memref<128x128xi8, #tpu.memory_space<vmem>>, %arg3: memref<128x8xbf16, #tpu.memory_space<vmem>>, %arg4: memref<128x1xf32, #tpu.memory_space<vmem>>, %arg5: memref<1x8xf32, #tpu.memory_space<vmem>>, %arg6: memref<8x8xf32, #tpu.memory_space<vmem>>, %arg7: memref<1x8xf32, #tpu.memory_space<vmem>>, %arg8: memref<128x1xf32, #tpu.memory_space<vmem>>, %arg9: memref<128x8xbf16, #tpu.memory_space<vmem>>, %arg10: memref<128x8xf32, #tpu.memory_space<vmem>>) attributes {dimension_semantics = [#tpu.dimension_semantics<parallel>, #tpu.dimension_semantics<arbitrary>], iteration_bounds = array<i64: 1, 1>, scalar_prefetch = 0 : i64, scratch_operands = 1 : i64, tpu.core_type = #tpu.core_type<tc>, window_params = [{transform_indices = @transform_0, window_bounds = array<i64: 128, 128>}, {transform_indices = @transform_1, window_bounds = array<i64: 128, 8>}, {transform_indices = @transform_2, window_bounds = array<i64: 128, 1>}, {pipeline_mode = #tpu.pipeline_mode<synchronous>, transform_indices = @transform_3, window_bounds = array<i64: 1, 8>}, {pipeline_mode = #tpu.pipeline_mode<synchronous>, transform_indices = @transform_4, window_bounds = array<i64: 8, 8>}, {pipeline_mode = #tpu.pipeline_mode<synchronous>, transform_indices = @transform_5, window_bounds = array<i64: 1, 8>}, {transform_indices = @transform_6, window_bounds = array<i64: 128, 1>}, {transform_indices = @transform_7, window_bounds = array<i64: 128, 8>}]} {
    %c0_i32 = arith.constant 0 : i32
    %0 = arith.cmpi eq, %arg1, %c0_i32 : i32
    %1 = arith.extui %0 : i1 to i32
    %c0_i32_0 = arith.constant 0 : i32
    %2 = arith.cmpi ne, %1, %c0_i32_0 : i32
    scf.if %2 {
      %cst_10 = arith.constant 0.000000e+00 : f32
      %14 = vector.broadcast %cst_10 : f32 to vector<128x8xf32>
      %c0_11 = arith.constant 0 : index
      %c0_12 = arith.constant 0 : index
      %15 = vector.load %arg10[%c0_11, %c0_12] : memref<128x8xf32, #tpu.memory_space<vmem>>, vector<128x8xf32>
      tpu.vector_store %arg10[%c0_11, %c0_12], %14 {strides = array<i32>} : memref<128x8xf32, #tpu.memory_space<vmem>>, vector<128x8xf32>,
    } else {
    }
    %c0 = arith.constant 0 : index
    %c0_1 = arith.constant 0 : index
    %3 = vector.load %arg2[%c0, %c0_1] : memref<128x128xi8, #tpu.memory_space<vmem>>, vector<128x128xi8>
    %4 = arith.sitofp %3 : vector<128x128xi8> to vector<128x128xf32>
    %5 = arith.truncf %4 : vector<128x128xf32> to vector<128x128xbf16>
    %c0_2 = arith.constant 0 : index
    %c0_3 = arith.constant 0 : index
    %6 = vector.load %arg10[%c0_2, %c0_3] : memref<128x8xf32, #tpu.memory_space<vmem>>, vector<128x8xf32>
    %c0_4 = arith.constant 0 : index
    %c0_5 = arith.constant 0 : index
    %7 = vector.load %arg3[%c0_4, %c0_5] : memref<128x8xbf16, #tpu.memory_space<vmem>>, vector<128x8xbf16>
    %cst = arith.constant dense<0.000000e+00> : vector<128x8xf32>
    %8 = tpu.matmul %5, %7, %cst {dimension_numbers = #tpu.dot_dimension_numbers<[1], [0], [0], [1], [0, 0, 1, 1], [], []>} : vector<128x128xbf16>, vector<128x8xbf16>, vector<128x8xf32> -> vector<128x8xf32>
    %9 = arith.addf %6, %8 : vector<128x8xf32>
    %c0_6 = arith.constant 0 : index
    %c0_7 = arith.constant 0 : index
    %10 = vector.load %arg10[%c0_6, %c0_7] : memref<128x8xf32, #tpu.memory_space<vmem>>, vector<128x8xf32>
    tpu.vector_store %arg10[%c0_6, %c0_7], %9 {strides = array<i32>} : memref<128x8xf32, #tpu.memory_space<vmem>>, vector<128x8xf32>,
    %c0_i32_8 = arith.constant 0 : i32
    %11 = arith.cmpi eq, %arg1, %c0_i32_8 : i32
    %12 = arith.extui %11 : i1 to i32
    %c0_i32_9 = arith.constant 0 : i32
    %13 = arith.cmpi ne, %12, %c0_i32_9 : i32
    scf.if %13 {
      %c0_10 = arith.constant 0 : index
      %c0_11 = arith.constant 0 : index
      %14 = vector.load %arg4[%c0_10, %c0_11] : memref<128x1xf32, #tpu.memory_space<vmem>>, vector<128x1xf32>
      %c0_12 = arith.constant 0 : index
      %c0_13 = arith.constant 0 : index
      %15 = vector.load %arg10[%c0_12, %c0_13] : memref<128x8xf32, #tpu.memory_space<vmem>>, vector<128x8xf32>
      %16 = vector.broadcast %14 : vector<128x1xf32> to vector<128x8xf32>
      %17 = arith.mulf %16, %15 : vector<128x8xf32>
      %c0_14 = arith.constant 0 : index
      %c0_15 = arith.constant 0 : index
      %18 = vector.load %arg5[%c0_14, %c0_15] : memref<1x8xf32, #tpu.memory_space<vmem>>, vector<1x8xf32>
      %19 = vector.broadcast %18 : vector<1x8xf32> to vector<128x8xf32>
      %20 = arith.addf %17, %19 : vector<128x8xf32>
      %c0_16 = arith.constant 0 : index
      %c0_17 = arith.constant 0 : index
      %21 = vector.load %arg6[%c0_16, %c0_17] : memref<8x8xf32, #tpu.memory_space<vmem>>, vector<8x8xf32>
      %cst_18 = arith.constant dense<0.000000e+00> : vector<128x8xf32>
      %22 = tpu.matmul %20, %21, %cst_18 {dimension_numbers = #tpu.dot_dimension_numbers<[1], [0], [0], [1], [0, 0, 1, 1], [], []>} : vector<128x8xf32>, vector<8x8xf32>, vector<128x8xf32> -> vector<128x8xf32>
      %c0_19 = arith.constant 0 : index
      %c0_20 = arith.constant 0 : index
      %23 = vector.load %arg7[%c0_19, %c0_20] : memref<1x8xf32, #tpu.memory_space<vmem>>, vector<1x8xf32>
      %24 = vector.broadcast %23 : vector<1x8xf32> to vector<128x8xf32>
      %25 = arith.addf %22, %24 : vector<128x8xf32>
      %c0_21 = arith.constant 0 : index
      %c0_22 = arith.constant 0 : index
      %26 = vector.load %arg8[%c0_21, %c0_22] : memref<128x1xf32, #tpu.memory_space<vmem>>, vector<128x1xf32>
      %27 = vector.broadcast %26 : vector<128x1xf32> to vector<128x8xf32>
      %28 = arith.mulf %27, %25 : vector<128x8xf32>
      %29 = arith.truncf %28 : vector<128x8xf32> to vector<128x8xbf16>
      %c0_23 = arith.constant 0 : index
      %c0_24 = arith.constant 0 : index
      %30 = vector.load %arg9[%c0_23, %c0_24] : memref<128x8xbf16, #tpu.memory_space<vmem>>, vector<128x8xbf16>
      tpu.vector_store %arg9[%c0_23, %c0_24], %29 {strides = array<i32>} : memref<128x8xbf16, #tpu.memory_space<vmem>>, vector<128x8xbf16>,
    } else {
    }
    return
  }
  func.func @transform_0(%arg0: i32, %arg1: i32) -> (i32, i32) {
    %c0_i32 = arith.constant 0 : i32
    return %arg0, %arg1 : i32, i32
  }
  func.func @transform_1(%arg0: i32, %arg1: i32) -> (i32, i32) {
    %c0_i32 = arith.constant 0 : i32
    %c0_i32_0 = arith.constant 0 : i32
    return %arg1, %c0_i32 : i32, i32
  }
  func.func @transform_2(%arg0: i32, %arg1: i32) -> (i32, i32) {
    %c0_i32 = arith.constant 0 : i32
    %c0_i32_0 = arith.constant 0 : i32
    return %arg0, %c0_i32 : i32, i32
  }
  func.func @transform_3(%arg0: i32, %arg1: i32) -> (i32, i32) {
    %c0_i32 = arith.constant 0 : i32
    %c0_i32_0 = arith.constant 0 : i32
    %c0_i32_1 = arith.constant 0 : i32
    return %c0_i32, %c0_i32_0 : i32, i32
  }
  func.func @transform_4(%arg0: i32, %arg1: i32) -> (i32, i32) {
    %c0_i32 = arith.constant 0 : i32
    %c0_i32_0 = arith.constant 0 : i32
    %c0_i32_1 = arith.constant 0 : i32
    return %c0_i32, %c0_i32_0 : i32, i32
  }
  func.func @transform_5(%arg0: i32, %arg1: i32) -> (i32, i32) {
    %c0_i32 = arith.constant 0 : i32
    %c0_i32_0 = arith.constant 0 : i32
    %c0_i32_1 = arith.constant 0 : i32
    return %c0_i32, %c0_i32_0 : i32, i32
  }
  func.func @transform_6(%arg0: i32, %arg1: i32) -> (i32, i32) {
    %c0_i32 = arith.constant 0 : i32
    %c0_i32_0 = arith.constant 0 : i32
    return %arg0, %c0_i32 : i32, i32
  }
  func.func @transform_7(%arg0: i32, %arg1: i32) -> (i32, i32) {
    %c0_i32 = arith.constant 0 : i32
    %c0_i32_0 = arith.constant 0 : i32
    return %arg0, %c0_i32 : i32, i32
  }
}

module attributes {stable_mosaic.version = 11 : i64} {
  func.func @gconv_kernel(%arg0: i32, %arg1: i32, %arg2: memref<128x128xi8, #tpu.memory_space<vmem>>, %arg3: memref<128x8xbf16, #tpu.memory_space<vmem>>, %arg4: memref<128x1xf32, #tpu.memory_space<vmem>>, %arg5: memref<1x8xf32, #tpu.memory_space<vmem>>, %arg6: memref<8x8xf32, #tpu.memory_space<vmem>>, %arg7: memref<1x8xf32, #tpu.memory_space<vmem>>, %arg8: memref<128x1xf32, #tpu.memory_space<vmem>>, %arg9: memref<128x8xf32, #tpu.memory_space<vmem>>, %arg10: memref<128x8xf32, #tpu.memory_space<vmem>>) attributes {dimension_semantics = [#tpu.dimension_semantics<parallel>, #tpu.dimension_semantics<arbitrary>], iteration_bounds = array<i64: 1, 1>, scalar_prefetch = 0 : i64, scratch_operands = 1 : i64, tpu.core_type = #tpu.core_type<tc>, window_params = [{transform_indices = @transform_0, window_bounds = array<i64: 128, 128>}, {transform_indices = @transform_1, window_bounds = array<i64: 128, 8>}, {transform_indices = @transform_2, window_bounds = array<i64: 128, 1>}, {pipeline_mode = #tpu.pipeline_mode<synchronous>, transform_indices = @transform_3, window_bounds = array<i64: 1, 8>}, {pipeline_mode = #tpu.pipeline_mode<synchronous>, transform_indices = @transform_4, window_bounds = array<i64: 8, 8>}, {pipeline_mode = #tpu.pipeline_mode<synchronous>, transform_indices = @transform_5, window_bounds = array<i64: 1, 8>}, {transform_indices = @transform_6, window_bounds = array<i64: 128, 1>}, {transform_indices = @transform_7, window_bounds = array<i64: 128, 8>}]} {
    %c0_i32 = arith.constant 0 : i32
    %0 = arith.cmpi eq, %arg1, %c0_i32 : i32
    %1 = arith.extui %0 : i1 to i32
    %c0_i32_0 = arith.constant 0 : i32
    %2 = arith.cmpi ne, %1, %c0_i32_0 : i32
    scf.if %2 {
      %cst_10 = arith.constant 0.000000e+00 : f32
      %14 = vector.broadcast %cst_10 : f32 to vector<128x8xf32>
      %c0_11 = arith.constant 0 : index
      %c0_12 = arith.constant 0 : index
      %15 = vector.load %arg10[%c0_11, %c0_12] : memref<128x8xf32, #tpu.memory_space<vmem>>, vector<128x8xf32>
      tpu.vector_store %arg10[%c0_11, %c0_12], %14 {strides = array<i32>} : memref<128x8xf32, #tpu.memory_space<vmem>>, vector<128x8xf32>,
    } else {
    }
    %c0 = arith.constant 0 : index
    %c0_1 = arith.constant 0 : index
    %3 = vector.load %arg2[%c0, %c0_1] : memref<128x128xi8, #tpu.memory_space<vmem>>, vector<128x128xi8>
    %4 = arith.sitofp %3 : vector<128x128xi8> to vector<128x128xf32>
    %5 = arith.truncf %4 : vector<128x128xf32> to vector<128x128xbf16>
    %c0_2 = arith.constant 0 : index
    %c0_3 = arith.constant 0 : index
    %6 = vector.load %arg10[%c0_2, %c0_3] : memref<128x8xf32, #tpu.memory_space<vmem>>, vector<128x8xf32>
    %c0_4 = arith.constant 0 : index
    %c0_5 = arith.constant 0 : index
    %7 = vector.load %arg3[%c0_4, %c0_5] : memref<128x8xbf16, #tpu.memory_space<vmem>>, vector<128x8xbf16>
    %cst = arith.constant dense<0.000000e+00> : vector<128x8xf32>
    %8 = tpu.matmul %5, %7, %cst {dimension_numbers = #tpu.dot_dimension_numbers<[1], [0], [0], [1], [0, 0, 1, 1], [], []>} : vector<128x128xbf16>, vector<128x8xbf16>, vector<128x8xf32> -> vector<128x8xf32>
    %9 = arith.addf %6, %8 : vector<128x8xf32>
    %c0_6 = arith.constant 0 : index
    %c0_7 = arith.constant 0 : index
    %10 = vector.load %arg10[%c0_6, %c0_7] : memref<128x8xf32, #tpu.memory_space<vmem>>, vector<128x8xf32>
    tpu.vector_store %arg10[%c0_6, %c0_7], %9 {strides = array<i32>} : memref<128x8xf32, #tpu.memory_space<vmem>>, vector<128x8xf32>,
    %c0_i32_8 = arith.constant 0 : i32
    %11 = arith.cmpi eq, %arg1, %c0_i32_8 : i32
    %12 = arith.extui %11 : i1 to i32
    %c0_i32_9 = arith.constant 0 : i32
    %13 = arith.cmpi ne, %12, %c0_i32_9 : i32
    scf.if %13 {
      %c0_10 = arith.constant 0 : index
      %c0_11 = arith.constant 0 : index
      %14 = vector.load %arg4[%c0_10, %c0_11] : memref<128x1xf32, #tpu.memory_space<vmem>>, vector<128x1xf32>
      %c0_12 = arith.constant 0 : index
      %c0_13 = arith.constant 0 : index
      %15 = vector.load %arg10[%c0_12, %c0_13] : memref<128x8xf32, #tpu.memory_space<vmem>>, vector<128x8xf32>
      %16 = vector.broadcast %14 : vector<128x1xf32> to vector<128x8xf32>
      %17 = arith.mulf %16, %15 : vector<128x8xf32>
      %c0_14 = arith.constant 0 : index
      %c0_15 = arith.constant 0 : index
      %18 = vector.load %arg5[%c0_14, %c0_15] : memref<1x8xf32, #tpu.memory_space<vmem>>, vector<1x8xf32>
      %19 = vector.broadcast %18 : vector<1x8xf32> to vector<128x8xf32>
      %20 = arith.addf %17, %19 : vector<128x8xf32>
      %c0_16 = arith.constant 0 : index
      %c0_17 = arith.constant 0 : index
      %21 = vector.load %arg6[%c0_16, %c0_17] : memref<8x8xf32, #tpu.memory_space<vmem>>, vector<8x8xf32>
      %cst_18 = arith.constant dense<0.000000e+00> : vector<128x8xf32>
      %22 = tpu.matmul %20, %21, %cst_18 {dimension_numbers = #tpu.dot_dimension_numbers<[1], [0], [0], [1], [0, 0, 1, 1], [], []>} : vector<128x8xf32>, vector<8x8xf32>, vector<128x8xf32> -> vector<128x8xf32>
      %c0_19 = arith.constant 0 : index
      %c0_20 = arith.constant 0 : index
      %23 = vector.load %arg7[%c0_19, %c0_20] : memref<1x8xf32, #tpu.memory_space<vmem>>, vector<1x8xf32>
      %24 = vector.broadcast %23 : vector<1x8xf32> to vector<128x8xf32>
      %25 = arith.addf %22, %24 : vector<128x8xf32>
      %c0_21 = arith.constant 0 : index
      %c0_22 = arith.constant 0 : index
      %26 = vector.load %arg8[%c0_21, %c0_22] : memref<128x1xf32, #tpu.memory_space<vmem>>, vector<128x1xf32>
      %27 = vector.broadcast %26 : vector<128x1xf32> to vector<128x8xf32>
      %28 = arith.mulf %27, %25 : vector<128x8xf32>
      %c0_23 = arith.constant 0 : index
      %c0_24 = arith.constant 0 : index
      %29 = vector.load %arg9[%c0_23, %c0_24] : memref<128x8xf32, #tpu.memory_space<vmem>>, vector<128x8xf32>
      tpu.vector_store %arg9[%c0_23, %c0_24], %28 {strides = array<i32>} : memref<128x8xf32, #tpu.memory_space<vmem>>, vector<128x8xf32>,
    } else {
    }
    return
  }
  func.func @transform_0(%arg0: i32, %arg1: i32) -> (i32, i32) {
    %c0_i32 = arith.constant 0 : i32
    return %arg0, %arg1 : i32, i32
  }
  func.func @transform_1(%arg0: i32, %arg1: i32) -> (i32, i32) {
    %c0_i32 = arith.constant 0 : i32
    %c0_i32_0 = arith.constant 0 : i32
    return %arg1, %c0_i32 : i32, i32
  }
  func.func @transform_2(%arg0: i32, %arg1: i32) -> (i32, i32) {
    %c0_i32 = arith.constant 0 : i32
    %c0_i32_0 = arith.constant 0 : i32
    return %arg0, %c0_i32 : i32, i32
  }
  func.func @transform_3(%arg0: i32, %arg1: i32) -> (i32, i32) {
    %c0_i32 = arith.constant 0 : i32
    %c0_i32_0 = arith.constant 0 : i32
    %c0_i32_1 = arith.constant 0 : i32
    return %c0_i32, %c0_i32_0 : i32, i32
  }
  func.func @transform_4(%arg0: i32, %arg1: i32) -> (i32, i32) {
    %c0_i32 = arith.constant 0 : i32
    %c0_i32_0 = arith.constant 0 : i32
    %c0_i32_1 = arith.constant 0 : i32
    return %c0_i32, %c0_i32_0 : i32, i32
  }
  func.func @transform_5(%arg0: i32, %arg1: i32) -> (i32, i32) {
    %c0_i32 = arith.constant 0 : i32
    %c0_i32_0 = arith.constant 0 : i32
    %c0_i32_1 = arith.constant 0 : i32
    return %c0_i32, %c0_i32_0 : i32, i32
  }
  func.func @transform_6(%arg0: i32, %arg1: i32) -> (i32, i32) {
    %c0_i32 = arith.constant 0 : i32
    %c0_i32_0 = arith.constant 0 : i32
    return %arg0, %c0_i32 : i32, i32
  }
  func.func @transform_7(%arg0: i32, %arg1: i32) -> (i32, i32) {
    %c0_i32 = arith.constant 0 : i32
    %c0_i32_0 = arith.constant 0 : i32
    return %arg0, %c0_i32 : i32, i32
  }
}

</mosaic_0001>

<bundles_post_ra>
// kernel: test_forward.3
= control target key start
LH: loop header
LB: loop body
LE: loop exit
PB: predicated region body
PF: predicated region fallthrough
CT: control target
= control target key end

     0   :  { %vm183_vm0 = vcmask 7168   ;;  %v322_v3 = vmov 0.0   ;;  %s574_s0 = inlined_call_operand.vmem [shape: f32[128,128], index: 0, kind: input, shape index: {}]   ;;  %s575_s2 = inlined_call_operand.vmem [shape: f32[128,1], index: 2, kind: output, shape index: {1}]   ;;  %s576_s1 = inlined_call_operand.vmem [shape: s8[128,128], index: 1, kind: output, shape index: {0}]  }
   0x1   :  { %v85_v0 = vld [vmem:[%s574_s0 + $0x10] sm:$0xff]  ;;  %v83_v1 = vld [vmem:[%s574_s0] sm:$0xff]  ;;  %v86_v2 = vld [vmem:[%s574_s0 + $0x18] sm:$0xff]  ;;  %186 = vst.msk [vmem:[%s575_s2 + $0x10] sm:$0xff] %vm183_vm0, %v322_v3 }
   0x2   :  { %184 = vst.msk [vmem:[%s575_s2] sm:$0xff] %vm183_vm0, %v322_v3  ;;  %185 = vst.msk [vmem:[%s575_s2 + $0x8] sm:$0xff] %vm183_vm0, %v322_v3  ;;  %220 = vadd.xlane.f32.xlu1 %v85_v0  ;;  %v117_v4 = vmax.f32 %v85_v0, -128.0  ;;  %216 = vadd.xlane.f32.xlu0 %v83_v1  ;;  %v115_v5 = vmax.f32 %v83_v1, -128.0  ;;  %v118_v6 = vmax.f32 %v86_v2, -128.0  ;;  %v84_v7 = vld [vmem:[%s574_s0 + $0x8] sm:$0xff] }
   0x3   :  { %187 = vst.msk [vmem:[%s575_s2 + $0x18] sm:$0xff] %vm183_vm0, %v322_v3  ;;  %188 = vst.msk [vmem:[%s575_s2 + $0x20] sm:$0xff] %vm183_vm0, %v322_v3  ;;  %v88_v8 = vld [vmem:[%s574_s0 + $0x28] sm:$0xff]  ;;  %v87_v9 = vld [vmem:[%s574_s0 + $0x20] sm:$0xff]  ;;  %v116_v10 = vmax.f32 %v84_v7, -128.0 }
   0x4   :  { %189 = vst.msk [vmem:[%s575_s2 + $0x28] sm:$0xff] %vm183_vm0, %v322_v3  ;;  %190 = vst.msk [vmem:[%s575_s2 + $0x30] sm:$0xff] %vm183_vm0, %v322_v3  ;;  %v120_v11 = vmax.f32 %v88_v8, -128.0  ;;  %v119_v12 = vmax.f32 %v87_v9, -128.0  ;;  %v90_v13 = vld [vmem:[%s574_s0 + $0x38] sm:$0xff]  ;;  %v133_v14 = vmin.f32 %v117_v4, 127.0 }
   0x5   :  { %191 = vst.msk [vmem:[%s575_s2 + $0x38] sm:$0xff] %vm183_vm0, %v322_v3  ;;  %192 = vst.msk [vmem:[%s575_s2 + $0x40] sm:$0xff] %vm183_vm0, %v322_v3  ;;  %v131_v15 = vmin.f32 %v115_v5, 127.0  ;;  %v134_v16 = vmin.f32 %v118_v6, 127.0  ;;  %v122_v17 = vmax.f32 %v90_v13, -128.0  ;;  %v89_v18 = vld [vmem:[%s574_s0 + $0x30] sm:$0xff] }
   0x6   :  { %193 = vst.msk [vmem:[%s575_s2 + $0x48] sm:$0xff] %vm183_vm0, %v322_v3  ;;  %194 = vst.msk [vmem:[%s575_s2 + $0x50] sm:$0xff] %vm183_vm0, %v322_v3  ;;  %v132_v19 = vmin.f32 %v116_v10, 127.0  ;;  %v136_v20 = vmin.f32 %v120_v11, 127.0  ;;  %v135_v21 = vmin.f32 %v119_v12, 127.0  ;;  %v121_v22 = vmax.f32 %v89_v18, -128.0  ;;  %222 = vadd.xlane.f32.xlu1 %v86_v2  ;;  %218 = vadd.xlane.f32.xlu0 %v84_v7 }
   0x7   :  { %195 = vst.msk [vmem:[%s575_s2 + $0x58] sm:$0xff] %vm183_vm0, %v322_v3  ;;  %196 = vst.msk [vmem:[%s575_s2 + $0x60] sm:$0xff] %vm183_vm0, %v322_v3  ;;  %v293_v23 = vtrunc.f32 %v133_v14  ;;  %v289_v24 = vtrunc.f32 %v131_v15  ;;  %v295_v25 = vtrunc.f32 %v134_v16  ;;  %v138_v26 = vmin.f32 %v122_v17, 127.0  ;;  %v92_v39 = vld [vmem:[%s574_s0 + $0x48] sm:$0xff]  ;;  %v91_v40 = vld [vmem:[%s574_s0 + $0x40] sm:$0xff] }
   0x8   :  { %197 = vst.msk [vmem:[%s575_s2 + $0x68] sm:$0xff] %vm183_vm0, %v322_v3  ;;  %198 = vst.msk [vmem:[%s575_s2 + $0x70] sm:$0xff] %vm183_vm0, %v322_v3  ;;  %v291_v27 = vtrunc.f32 %v132_v19  ;;  %v299_v28 = vtrunc.f32 %v136_v20  ;;  %v297_v29 = vtrunc.f32 %v135_v21  ;;  %v137_v30 = vmin.f32 %v121_v22, 127.0  ;;  %v94_v45 = vld [vmem:[%s574_s0 + $0x58] sm:$0xff]  ;;  %v93_v50 = vld [vmem:[%s574_s0 + $0x50] sm:$0xff] }
   0x9   :  { %199 = vst.msk [vmem:[%s575_s2 + $0x78] sm:$0xff] %vm183_vm0, %v322_v3  ;;  %v294_v31 = vcvt.f32.s32 %v293_v23  ;;  %v290_v32 = vcvt.f32.s32 %v289_v24  ;;  %v296_v33 = vcvt.f32.s32 %v295_v25  ;;  %v303_v34 = vtrunc.f32 %v138_v26  ;;  %v96_v51 = vld [vmem:[%s574_s0 + $0x68] sm:$0xff]  ;;  %v95_v56 = vld [vmem:[%s574_s0 + $0x60] sm:$0xff]  ;;  %v98_v1 = vld [vmem:[%s574_s0 + $0x78] sm:$0xff] }
   0xa   :  { %v292_v35 = vcvt.f32.s32 %v291_v27  ;;  %v300_v36 = vcvt.f32.s32 %v299_v28  ;;  %v298_v37 = vcvt.f32.s32 %v297_v29  ;;  %v301_v38 = vtrunc.f32 %v137_v30  ;;  %226 = vadd.xlane.f32.xlu1 %v88_v8  ;;  %224 = vadd.xlane.f32.xlu0 %v87_v9  ;;  %v97_v10 = vld [vmem:[%s574_s0 + $0x70] sm:$0xff]  ;;  %v200_v30 = vld [vmem:[%s575_s2] sm:$0xff] }
   0xb   :  { %v164_v41 = vpack.c.b16 %v296_v33, %v294_v31  ;;  %v304_v42 = vcvt.f32.s32 %v303_v34  ;;  %v124_v43 = vmax.f32 %v92_v39, -128.0  ;;  %v123_v44 = vmax.f32 %v91_v40, -128.0  ;;  %v202_v29 = vld [vmem:[%s575_s2 + $0x10] sm:$0xff] }
   0xc   :  { %v163_v46 = vpack.c.b16 %v292_v35, %v290_v32  ;;  %v166_v47 = vpack.c.b16 %v300_v36, %v298_v37  ;;  %v302_v48 = vcvt.f32.s32 %v301_v38  ;;  %v126_v49 = vmax.f32 %v94_v45, -128.0  ;;  %v203_v35 = vld [vmem:[%s575_s2 + $0x18] sm:$0xff]  ;;  %v201_v36 = vld [vmem:[%s575_s2 + $0x8] sm:$0xff] }
   0xd   :  { %v140_v52 = vmin.f32 %v124_v43, 127.0  ;;  %v139_v53 = vmin.f32 %v123_v44, 127.0  ;;  %v125_v54 = vmax.f32 %v93_v50, -128.0  ;;  %v128_v55 = vmax.f32 %v96_v51, -128.0 }
   0xe   :  { %v165_v57 = vpack.c.b8 %v164_v41, %v163_v46  ;;  %v167_v58 = vpack.c.b16 %v304_v42, %v302_v48  ;;  %v142_v59 = vmin.f32 %v126_v49, 127.0  ;;  %v127_v60 = vmax.f32 %v95_v56, -128.0  ;;  %230 = vadd.xlane.f32.xlu1 %v90_v13  ;;  %228 = vadd.xlane.f32.xlu0 %v89_v18  ;;  %v205_v41 = vld [vmem:[%s575_s2 + $0x28] sm:$0xff]  ;;  %v204_v42 = vld [vmem:[%s575_s2 + $0x20] sm:$0xff]  ;;  %v206_v48 = vld [vmem:[%s575_s2 + $0x30] sm:$0xff] }
   0xf   :  { %v307_v61 = vtrunc.f32 %v140_v52  ;;  %v305_v62 = vtrunc.f32 %v139_v53  ;;  %v141_v63 = vmin.f32 %v125_v54, 127.0  ;;  %v144_v0 = vmin.f32 %v128_v55, 127.0  ;;  %v209_v53 = vld [vmem:[%s575_s2 + $0x48] sm:$0xff]  ;;  %v208_v54 = vld [vmem:[%s575_s2 + $0x40] sm:$0xff] }
  0x10   :  { %175 = vst [vmem:[%s576_s1] sm:$0xff] %v165_v57  ;;  %v168_v2 = vpack.c.b8 %v167_v58, %v166_v47  ;;  %v311_v3 = vtrunc.f32 %v142_v59  ;;  %v143_v4 = vmin.f32 %v127_v60, 127.0  ;;  %v130_v5 = vmax.f32 %v98_v1, -128.0  ;;  %v207_v47 = vld [vmem:[%s575_s2 + $0x38] sm:$0xff]  ;;  %v210_v60 = vld [vmem:[%s575_s2 + $0x50] sm:$0xff] }
  0x11   :  { %v308_v6 = vcvt.f32.s32 %v307_v61  ;;  %v306_v7 = vcvt.f32.s32 %v305_v62  ;;  %v309_v8 = vtrunc.f32 %v141_v63  ;;  %v315_v9 = vtrunc.f32 %v144_v0  ;;  %v211_v59 = vld [vmem:[%s575_s2 + $0x58] sm:$0xff] }
  0x12   :  { %176 = vst [vmem:[%s576_s1 + $0x8] sm:$0xff] %v168_v2  ;;  %v312_v11 = vcvt.f32.s32 %v311_v3  ;;  %v313_v12 = vtrunc.f32 %v143_v4  ;;  %v146_v13 = vmin.f32 %v130_v5, 127.0  ;;  %v129_v14 = vmax.f32 %v97_v10, -128.0  ;;  %234 = vadd.xlane.f32.xlu1 %v92_v39  ;;  %232 = vadd.xlane.f32.xlu0 %v91_v40  ;;  %v212_v2 = vld [vmem:[%s575_s2 + $0x60] sm:$0xff] }
  0x13   :  { %v169_v15 = vpack.c.b16 %v308_v6, %v306_v7  ;;  %v310_v16 = vcvt.f32.s32 %v309_v8  ;;  %v316_v17 = vcvt.f32.s32 %v315_v9  ;;  %v215_v7 = vld [vmem:[%s575_s2 + $0x78] sm:$0xff]  ;;  %v214_v8 = vld [vmem:[%s575_s2 + $0x70] sm:$0xff] }
  0x14   :  { %v314_v18 = vcvt.f32.s32 %v313_v12  ;;  %v319_v19 = vtrunc.f32 %v146_v13  ;;  %v145_v20 = vmin.f32 %v129_v14, 127.0 }
  0x15   :  { %v170_v21 = vpack.c.b16 %v312_v11, %v310_v16 }
  0x16   :  { %v320_v22 = vcvt.f32.s32 %v319_v19  ;;  %v317_v23 = vtrunc.f32 %v145_v20  ;;  %238 = vadd.xlane.f32.xlu1 %v94_v45  ;;  %236 = vadd.xlane.f32.xlu0 %v93_v50  ;;  %v172_v25 = vpack.c.b16 %v316_v17, %v314_v18 }
  0x17   :  { %v171_v24 = vpack.c.b8 %v170_v21, %v169_v15 }
  0x18   :  { %v318_v26 = vcvt.f32.s32 %v317_v23 }
  0x19   :  { %177 = vst [vmem:[%s576_s1 + $0x10] sm:$0xff] %v171_v24 }
  0x1a   :  { %v173_v27 = vpack.c.b16 %v320_v22, %v318_v26  ;;  %242 = vadd.xlane.f32.xlu1 %v96_v51  ;;  %240 = vadd.xlane.f32.xlu0 %v95_v56 }
  0x1c   :  { %v174_v28 = vpack.c.b8 %v173_v27, %v172_v25 }
  0x1e   :  { %178 = vst [vmem:[%s576_s1 + $0x18] sm:$0xff] %v174_v28  ;;  %246 = vadd.xlane.f32.xlu1 %v98_v1  ;;  %244 = vadd.xlane.f32.xlu0 %v97_v10  ;;  %v213_v1 = vld [vmem:[%s575_s2 + $0x68] sm:$0xff] }
  0x8b   :  { %v221_v31 = vpop.xlane.xlu1 %220  ;;  %v217_v32 = vpop.xlane.xlu0 %216 }
  0x8c   :  { %v250_v33 = vadd.f32 %v221_v31, %v202_v29  ;;  %v248_v34 = vadd.f32 %v217_v32, %v200_v30 }
  0x8e   :  { %267 = vst.msk [vmem:[%s575_s2 + $0x10] sm:$0xff] %vm183_vm0, %v250_v33  ;;  %265 = vst.msk [vmem:[%s575_s2] sm:$0xff] %vm183_vm0, %v248_v34 }
  0x8f   :  { %v223_v37 = vpop.xlane.xlu1 %222  ;;  %v219_v38 = vpop.xlane.xlu0 %218 }
  0x90   :  { %v251_v39 = vadd.f32 %v223_v37, %v203_v35  ;;  %v249_v40 = vadd.f32 %v219_v38, %v201_v36 }
  0x92   :  { %268 = vst.msk [vmem:[%s575_s2 + $0x18] sm:$0xff] %vm183_vm0, %v251_v39  ;;  %266 = vst.msk [vmem:[%s575_s2 + $0x8] sm:$0xff] %vm183_vm0, %v249_v40 }
  0x93   :  { %v227_v43 = vpop.xlane.xlu1 %226  ;;  %v225_v44 = vpop.xlane.xlu0 %224 }
  0x94   :  { %v253_v45 = vadd.f32 %v227_v43, %v205_v41  ;;  %v252_v46 = vadd.f32 %v225_v44, %v204_v42 }
  0x96   :  { %270 = vst.msk [vmem:[%s575_s2 + $0x28] sm:$0xff] %vm183_vm0, %v253_v45  ;;  %269 = vst.msk [vmem:[%s575_s2 + $0x20] sm:$0xff] %vm183_vm0, %v252_v46 }
  0x97   :  { %v231_v49 = vpop.xlane.xlu1 %230  ;;  %v229_v50 = vpop.xlane.xlu0 %228 }
  0x98   :  { %v255_v51 = vadd.f32 %v231_v49, %v207_v47  ;;  %v254_v52 = vadd.f32 %v229_v50, %v206_v48 }
  0x9a   :  { %272 = vst.msk [vmem:[%s575_s2 + $0x38] sm:$0xff] %vm183_vm0, %v255_v51  ;;  %271 = vst.msk [vmem:[%s575_s2 + $0x30] sm:$0xff] %vm183_vm0, %v254_v52 }
  0x9b   :  { %v235_v55 = vpop.xlane.xlu1 %234  ;;  %v233_v56 = vpop.xlane.xlu0 %232 }
  0x9c   :  { %v257_v57 = vadd.f32 %v235_v55, %v209_v53  ;;  %v256_v58 = vadd.f32 %v233_v56, %v208_v54 }
  0x9e   :  { %274 = vst.msk [vmem:[%s575_s2 + $0x48] sm:$0xff] %vm183_vm0, %v257_v57  ;;  %273 = vst.msk [vmem:[%s575_s2 + $0x40] sm:$0xff] %vm183_vm0, %v256_v58 }
  0x9f   :  { %v239_v61 = vpop.xlane.xlu1 %238  ;;  %v237_v62 = vpop.xlane.xlu0 %236 }
  0xa0   :  { %v259_v63 = vadd.f32 %v239_v61, %v211_v59  ;;  %v258_v0 = vadd.f32 %v237_v62, %v210_v60 }
  0xa2   :  { %276 = vst.msk [vmem:[%s575_s2 + $0x58] sm:$0xff] %vm183_vm0, %v259_v63  ;;  %275 = vst.msk [vmem:[%s575_s2 + $0x50] sm:$0xff] %vm183_vm0, %v258_v0 }
  0xa3   :  { %v243_v3 = vpop.xlane.xlu1 %242  ;;  %v241_v4 = vpop.xlane.xlu0 %240 }
  0xa4   :  { %v261_v5 = vadd.f32 %v243_v3, %v213_v1  ;;  %v260_v6 = vadd.f32 %v241_v4, %v212_v2 }
  0xa6   :  { %278 = vst.msk [vmem:[%s575_s2 + $0x68] sm:$0xff] %vm183_vm0, %v261_v5  ;;  %277 = vst.msk [vmem:[%s575_s2 + $0x60] sm:$0xff] %vm183_vm0, %v260_v6 }
  0xa7   :  { %v247_v9 = vpop.xlane.xlu1 %246  ;;  %v245_v10 = vpop.xlane.xlu0 %244 }
  0xa8   :  { %v263_v11 = vadd.f32 %v247_v9, %v215_v7  ;;  %v262_v12 = vadd.f32 %v245_v10, %v214_v8 }
  0xaa   :  { %280 = vst.msk [vmem:[%s575_s2 + $0x78] sm:$0xff] %vm183_vm0, %v263_v11  ;;  %279 = vst.msk [vmem:[%s575_s2 + $0x70] sm:$0xff] %vm183_vm0, %v262_v12 }

// kernel: test_forward.5
= control target key start
LH: loop header
LB: loop body
LE: loop exit
PB: predicated region body
PF: predicated region fallthrough
CT: control target
= control target key end

     0   :  { %v886_v1 = vmov 0   ;;  %vm31_vm0 = vcmask 64512   ;;  %v887_v45 = vmov 0.0   ;;  %s1217_s1 = inlined_call_operand.vmem [shape: bf16[128,8], index: 1, kind: input, shape index: {}]   ;;  %s1218_s0 = inlined_call_operand.vmem [shape: s8[128,128], index: 0, kind: input, shape index: {}]   ;;  %s1219_s2 = inlined_call_operand.vmem [shape: f32[128,1], index: 2, kind: input, shape index: {}]   ;;  %s1220_s6 = inlined_call_operand.vmem [shape: f32[128,1], index: 6, kind: input, shape index: {}]   ;;  %s1221_s4 = inlined_call_operand.vmem [shape: f32[8,8], index: 4, kind: input, shape index: {}]   ;;  %s1222_s3 = inlined_call_operand.vmem [shape: f32[1,8], index: 3, kind: input, shape index: {}]   ;;  %s1223_s5 = inlined_call_operand.vmem [shape: f32[1,8], index: 5, kind: input, shape index: {}]   ;;  %s1224_s7 = inlined_call_operand.vmem [shape: f32[128,8], index: 7, kind: output, shape index: {}]  }
   0x1   :  { %v878_v0 = vld [vmem:[%s1217_s1 + $0x38] sm:$0xff]   ;;  %876 = vset.pattern.permute.xlu0 %v886_v1  ;;  %877 = vset.pattern.permute.xlu1 %v886_v1  ;;  %v879_v2 = vld [vmem:[%s1217_s1 + $0x30] sm:$0xff]   ;;  %v880_v3 = vld [vmem:[%s1217_s1 + $0x28] sm:$0xff]   ;;  %34 = vst.msk [vmem:[#allocation2 + $0x10] sm:$0xff] %vm31_vm0, %v887_v45 }
   0x2   :  { %816 = vmatprep.subr.bf16.mxu0 %v878_v0  ;;  %v881_v4 = vld [vmem:[%s1217_s1 + $0x20] sm:$0xff]   ;;  %v275_v8 = vld [vmem:[%s1219_s2 + $0x10] sm:$0xff]  ;;  %v274_v9 = vld [vmem:[%s1219_s2 + $0x8] sm:$0xff]  ;;  %32 = vst.msk [vmem:[#allocation2] sm:$0xff] %vm31_vm0, %v887_v45 }
   0x3   :  { %817 = vmatpush3.bf16.msra.mxu0 %v878_v0  ;;  %v48_v5 = vld [vmem:[%s1218_s0] sm:$0xff]  ;;  %317 = vperm.xlu1 %877, %v275_v8   ;;  %v276_v10 = vld [vmem:[%s1219_s2 + $0x18] sm:$0xff]  ;;  %v278_v13 = vld [vmem:[%s1219_s2 + $0x28] sm:$0xff]  ;;  %33 = vst.msk [vmem:[#allocation2 + $0x8] sm:$0xff] %vm31_vm0, %v887_v45 }
   0x4   :  { %818 = vmatprep.subr.bf16.mxu0 %v879_v2  ;;  %v52_v6 = vunpack.c.l.s8.bf16 %v48_v5  ;;  %v273_v7 = vld [vmem:[%s1219_s2] sm:$0xff]  ;;  %v882_v11 = vld [vmem:[%s1217_s1 + $0x18] sm:$0xff]   ;;  %v883_v14 = vld [vmem:[%s1217_s1 + $0x10] sm:$0xff]   ;;  %v53_v24 = vunpack.c.h.s8.bf16 %v48_v5  ;;  %35 = vst.msk [vmem:[#allocation2 + $0x18] sm:$0xff] %vm31_vm0, %v887_v45 }
   0x5   :  { %307 = vperm.xlu0 %876, %v273_v7   ;;  %v277_v12 = vld [vmem:[%s1219_s2 + $0x20] sm:$0xff]  ;;  %v279_v15 = vld [vmem:[%s1219_s2 + $0x30] sm:$0xff]  ;;  %v280_v16 = vld [vmem:[%s1219_s2 + $0x38] sm:$0xff]  ;;  %36 = vst.msk [vmem:[#allocation2 + $0x20] sm:$0xff] %vm31_vm0, %v887_v45 }
   0x6   :  { %832 = vmatprep.mubr.bf16.mxu0 %v52_v6  ;;  %v884_v17 = vld [vmem:[%s1217_s1 + $0x8] sm:$0xff]   ;;  %v281_v18 = vld [vmem:[%s1219_s2 + $0x40] sm:$0xff]  ;;  %v283_v21 = vld [vmem:[%s1219_s2 + $0x50] sm:$0xff]  ;;  %37 = vst.msk [vmem:[#allocation2 + $0x28] sm:$0xff] %vm31_vm0, %v887_v45 }
   0x7   :  { %819 = vmatpush3.bf16.msra.mxu0 %v879_v2  ;;  %322 = vperm.xlu1 %877, %v276_v10   ;;  %v282_v19 = vld [vmem:[%s1219_s2 + $0x48] sm:$0xff]  ;;  %v885_v20 = vld [vmem:[%s1217_s1] sm:$0xff]   ;;  %v284_v22 = vld [vmem:[%s1219_s2 + $0x58] sm:$0xff]  ;;  %38 = vst.msk [vmem:[#allocation2 + $0x30] sm:$0xff] %vm31_vm0, %v887_v45 }
   0x8   :  { %820 = vmatprep.subr.bf16.mxu0 %v880_v3  ;;  %v49_v23 = vld [vmem:[%s1218_s0 + $0x8] sm:$0xff]  ;;  %v285_v26 = vld [vmem:[%s1219_s2 + $0x60] sm:$0xff]  ;;  %v287_v28 = vld [vmem:[%s1219_s2 + $0x70] sm:$0xff]  ;;  %39 = vst.msk [vmem:[#allocation2 + $0x38] sm:$0xff] %vm31_vm0, %v887_v45 }
   0x9   :  { %312 = vperm.xlu0 %876, %v274_v9   ;;  %v54_v25 = vunpack.c.l.s8.bf16 %v49_v23  ;;  %v286_v27 = vld [vmem:[%s1219_s2 + $0x68] sm:$0xff]  ;;  %v50_v29 = vld [vmem:[%s1218_s0 + $0x10] sm:$0xff]  ;;  %v288_v30 = vld [vmem:[%s1219_s2 + $0x78] sm:$0xff]  ;;  %v55_v31 = vunpack.c.h.s8.bf16 %v49_v23  ;;  %40 = vst.msk [vmem:[#allocation2 + $0x40] sm:$0xff] %vm31_vm0, %v887_v45 }
   0xa   :  { %v56_v32 = vunpack.c.l.s8.bf16 %v50_v29  ;;  %v625_v33 = vld [vmem:[%s1220_s6] sm:$0xff]  ;;  %v626_v34 = vld [vmem:[%s1220_s6 + $0x8] sm:$0xff]  ;;  %v627_v35 = vld [vmem:[%s1220_s6 + $0x10] sm:$0xff]  ;;  %v57_v38 = vunpack.c.h.s8.bf16 %v50_v29  ;;  %41 = vst.msk [vmem:[#allocation2 + $0x48] sm:$0xff] %vm31_vm0, %v887_v45 }
   0xb   :  { %821 = vmatpush3.bf16.msra.mxu0 %v880_v3  ;;  %332 = vperm.xlu1 %877, %v278_v13   ;;  %v51_v36 = vld [vmem:[%s1218_s0 + $0x18] sm:$0xff]  ;;  %v629_v40 = vld [vmem:[%s1220_s6 + $0x20] sm:$0xff]  ;;  %v630_v41 = vld [vmem:[%s1220_s6 + $0x28] sm:$0xff]  ;;  %42 = vst.msk [vmem:[#allocation2 + $0x50] sm:$0xff] %vm31_vm0, %v887_v45 }
   0xc   :  { %822 = vmatprep.subr.bf16.mxu0 %v881_v4  ;;  %v628_v37 = vld [vmem:[%s1220_s6 + $0x18] sm:$0xff]  ;;  %v58_v39 = vunpack.c.l.s8.bf16 %v51_v36  ;;  %v631_v42 = vld [vmem:[%s1220_s6 + $0x30] sm:$0xff]  ;;  %v59_v44 = vunpack.c.h.s8.bf16 %v51_v36  ;;  %43 = vst.msk [vmem:[#allocation2 + $0x58] sm:$0xff] %vm31_vm0, %v887_v45  ;;  %44 = vst.msk [vmem:[#allocation2 + $0x60] sm:$0xff] %vm31_vm0, %v887_v45 }
   0xd   :  { %327 = vperm.xlu0 %876, %v277_v12   ;;  %v632_v43 = vld [vmem:[%s1220_s6 + $0x38] sm:$0xff]  ;;  %45 = vst.msk [vmem:[#allocation2 + $0x68] sm:$0xff] %vm31_vm0, %v887_v45  ;;  %46 = vst.msk [vmem:[#allocation2 + $0x70] sm:$0xff] %vm31_vm0, %v887_v45  ;;  %v633_v46 = vld [vmem:[%s1220_s6 + $0x40] sm:$0xff] }
   0xe   :  { %47 = vst.msk [vmem:[#allocation2 + $0x78] sm:$0xff] %vm31_vm0, %v887_v45  ;;  %v634_v47 = vld [vmem:[%s1220_s6 + $0x48] sm:$0xff]  ;;  %v635_v48 = vld [vmem:[%s1220_s6 + $0x50] sm:$0xff]  ;;  %v636_v49 = vld [vmem:[%s1220_s6 + $0x58] sm:$0xff] }
   0xf   :  { %823 = vmatpush3.bf16.msra.mxu0 %v881_v4  ;;  %342 = vperm.xlu1 %877, %v280_v16   ;;  %v637_v50 = vld [vmem:[%s1220_s6 + $0x60] sm:$0xff]  ;;  %v638_v51 = vld [vmem:[%s1220_s6 + $0x68] sm:$0xff]  ;;  %v639_v52 = vld [vmem:[%s1220_s6 + $0x70] sm:$0xff] }
  0x10   :  { %824 = vmatprep.subr.bf16.mxu0 %v882_v11  ;;  %v640_v53 = vld [vmem:[%s1220_s6 + $0x78] sm:$0xff]  ;;  %v424_v54 = vld [vmem:[%s1221_s4] sm:$0xff]  ;;  %v62_v56 = vld [vmem:[#allocation2 + $0x10] sm:$0xff] }
  0x11   :  { %337 = vperm.xlu0 %876, %v279_v15   ;;  %848 = vmatprep.subr.mxu1 %v424_v54  ;;  %v60_v59 = vld [vmem:[#allocation2] sm:$0xff]  ;;  %v63_v62 = vld [vmem:[#allocation2 + $0x18] sm:$0xff]  ;;  %v61_v2 = vld [vmem:[#allocation2 + $0x8] sm:$0xff] }
  0x12   :  { %849 = vmatpush3.msra.mxu1 %v424_v54  ;;  %v66_v6 = vld [vmem:[#allocation2 + $0x30] sm:$0xff]  ;;  %v64_v9 = vld [vmem:[#allocation2 + $0x20] sm:$0xff]  ;;  %v67_v13 = vld [vmem:[#allocation2 + $0x38] sm:$0xff] }
  0x13   :  { %825 = vmatpush3.bf16.msra.mxu0 %v882_v11  ;;  %352 = vperm.xlu1 %877, %v282_v19   ;;  %v70_v23 = vld [vmem:[#allocation2 + $0x50] sm:$0xff]  ;;  %v68_v29 = vld [vmem:[#allocation2 + $0x40] sm:$0xff] }
  0x14   :  { %826 = vmatprep.subr.bf16.mxu0 %v883_v14 }
  0x15   :  { %347 = vperm.xlu0 %876, %v281_v18  }
  0x17   :  { %827 = vmatpush3.bf16.msra.mxu0 %v883_v14  ;;  %362 = vperm.xlu1 %877, %v284_v22  }
  0x18   :  { %828 = vmatprep.subr.bf16.mxu0 %v884_v17 }
  0x19   :  { %357 = vperm.xlu0 %876, %v283_v21  }
  0x1b   :  { %829 = vmatpush3.bf16.msra.mxu0 %v884_v17  ;;  %372 = vperm.xlu1 %877, %v286_v27   ;;  %v65_v17 = vld [vmem:[#allocation2 + $0x28] sm:$0xff] }
  0x1c   :  { %830 = vmatprep.subr.bf16.mxu0 %v885_v20 }
  0x1d   :  { %367 = vperm.xlu0 %876, %v285_v26  }
  0x1f   :  { %831 = vmatpush3.bf16.msra.mxu0 %v885_v20  ;;  %382 = vperm.xlu1 %877, %v288_v30  }
  0x21   :  { %377 = vperm.xlu0 %876, %v287_v28  }
  0x22   :  { %833 = vmatmul.mubr.bf16.vlgmr.msra.gmra.mxu0 %v53_v24  ;;  %v1088_v24 = vld [vmem:[%s1222_s3] ss:$0 sm:$0xff] }
  0x23   :  { %836 = vmatprep.mubr.bf16.mxu0 %v54_v25  ;;  %648 = vperm.xlu1 %877, %v626_v34  }
  0x25   :  { %643 = vperm.xlu0 %876, %v625_v33  }
  0x27   :  { %658 = vperm.xlu1 %877, %v628_v37   ;;  %v71_v37 = vld [vmem:[#allocation2 + $0x58] sm:$0xff] }
  0x29   :  { %653 = vperm.xlu0 %876, %v627_v35  }
  0x2a   :  { %837 = vmatmul.mubr.bf16.gmra.mxu0 %v55_v31 }
  0x2b   :  { %840 = vmatprep.mubr.bf16.mxu0 %v56_v32  ;;  %668 = vperm.xlu1 %877, %v630_v41  }
  0x2d   :  { %663 = vperm.xlu0 %876, %v629_v40  }
  0x2f   :  { %678 = vperm.xlu1 %877, %v632_v43  }
  0x31   :  { %673 = vperm.xlu0 %876, %v631_v42   ;;  %v69_v42 = vld [vmem:[#allocation2 + $0x48] sm:$0xff] }
  0x32   :  { %841 = vmatmul.mubr.bf16.gmra.mxu0 %v57_v38 }
  0x33   :  { %844 = vmatprep.mubr.bf16.mxu0 %v58_v39  ;;  %688 = vperm.xlu1 %877, %v634_v47  }
  0x35   :  { %683 = vperm.xlu0 %876, %v633_v46  }
  0x37   :  { %698 = vperm.xlu1 %877, %v636_v49  }
  0x39   :  { %693 = vperm.xlu0 %876, %v635_v48  }
  0x3a   :  { %845 = vmatmul.mubr.bf16.gmra.mxu0 %v59_v44 }
  0x3b   :  { %708 = vperm.xlu1 %877, %v638_v51  }
  0x3d   :  { %703 = vperm.xlu0 %876, %v637_v50   ;;  %v74_v50 = vld [vmem:[#allocation2 + $0x70] sm:$0xff] }
  0x3f   :  { %718 = vperm.xlu1 %877, %v640_v53  }
  0x41   :  { %713 = vperm.xlu0 %876, %v639_v52  }
  0x7e   :  { %v318_v57 = vpop.permute.xlu1 %317 }
  0x80   :  { %v308_v55 = vpop.permute.xlu0 %307 }
  0x82   :  { %v323_v4 = vpop.permute.xlu1 %322 }
  0x84   :  { %v313_v63 = vpop.permute.xlu0 %312 }
  0x86   :  { %v333_v15 = vpop.permute.xlu1 %332 }
  0x88   :  { %v328_v10 = vpop.permute.xlu0 %327 }
  0x8a   :  { %v343_v35 = vpop.permute.xlu1 %342 }
  0x8c   :  { %v338_v25 = vpop.permute.xlu0 %337 }
  0x8e   :  { %v353_v54 = vpop.permute.xlu1 %352 }
  0x90   :  { %v348_v45 = vpop.permute.xlu0 %347 }
  0xe2   :  { %v834_v58 = vpop.f32.mrf.mxu0 }
  0xe3   :  { %v239_v60 = vadd.f32 %v834_v58, %v62_v56  ;;  %v72_v56 = vld [vmem:[#allocation2 + $0x60] sm:$0xff] }
  0xe4   :  { %v174_v61 = vpop.f32.mrf.mxu0 }
  0xe5   :  { %256 = vst.msk [vmem:[#allocation2 + $0x10] sm:$0xff] %vm31_vm0, %v239_v60  ;;  %v237_v0 = vadd.f32 %v174_v61, %v60_v59 }
  0xe6   :  { %v835_v1 = vpop.f32.mrf.mxu0 }
  0xe7   :  { %254 = vst.msk [vmem:[#allocation2] sm:$0xff] %vm31_vm0, %v237_v0  ;;  %v240_v3 = vadd.f32 %v835_v1, %v63_v62  ;;  %v358_v0 = vpop.permute.xlu0 %357 }
  0xe8   :  { %v177_v5 = vpop.f32.mrf.mxu0 }
  0xe9   :  { %257 = vst.msk [vmem:[#allocation2 + $0x18] sm:$0xff] %vm31_vm0, %v240_v3  ;;  %v238_v7 = vadd.f32 %v177_v5, %v61_v2  ;;  %v73_v5 = vld [vmem:[#allocation2 + $0x68] sm:$0xff] }
  0xea   :  { %v838_v8 = vpop.f32.mrf.mxu0 }
  0xeb   :  { %255 = vst.msk [vmem:[#allocation2 + $0x8] sm:$0xff] %vm31_vm0, %v238_v7  ;;  %v243_v11 = vadd.f32 %v838_v8, %v66_v6 }
  0xec   :  { %v190_v12 = vpop.f32.mrf.mxu0  ;;  %v291_v21 = vld [vmem:[#allocation2 + $0x10] sm:$0xff] }
  0xed   :  { %260 = vst.msk [vmem:[#allocation2 + $0x30] sm:$0xff] %vm31_vm0, %v243_v11  ;;  %v241_v14 = vadd.f32 %v190_v12, %v64_v9  ;;  %v387_v31 = vmul.f32 %v318_v57, %v291_v21  ;;  %v363_v11 = vpop.permute.xlu1 %362 }
  0xee   :  { %v839_v16 = vpop.f32.mrf.mxu0  ;;  %v289_v18 = vld [vmem:[#allocation2] sm:$0xff] }
  0xef   :  { %258 = vst.msk [vmem:[#allocation2 + $0x20] sm:$0xff] %vm31_vm0, %v241_v14  ;;  %v244_v19 = vadd.f32 %v839_v16, %v67_v13  ;;  %v385_v20 = vmul.f32 %v308_v55, %v289_v18  ;;  %v410_v43 = vadd.f32 %v1088_v24, %v387_v31 }
  0xf0   :  { %v193_v22 = vpop.f32.mrf.mxu0  ;;  %v292_v32 = vld [vmem:[#allocation2 + $0x18] sm:$0xff] }
  0xf1   :  { %261 = vst.msk [vmem:[#allocation2 + $0x38] sm:$0xff] %vm31_vm0, %v244_v19  ;;  %v242_v26 = vadd.f32 %v193_v22, %v65_v17  ;;  %v408_v27 = vadd.f32 %v1088_v24, %v385_v20  ;;  %v388_v40 = vmul.f32 %v323_v4, %v292_v32  ;;  %v368_v19 = vpop.permute.xlu0 %367 }
  0xf2   :  { %v842_v28 = vpop.f32.mrf.mxu0  ;;  %v290_v30 = vld [vmem:[#allocation2 + $0x8] sm:$0xff] }
  0xf3   :  { %259 = vst.msk [vmem:[#allocation2 + $0x28] sm:$0xff] %vm31_vm0, %v242_v26  ;;  %v247_v33 = vadd.f32 %v842_v28, %v70_v23  ;;  %850 = vmatprep.mubr.msk.f32.mxu1 %vm31_vm0, %v408_v27  ;;  %v386_v34 = vmul.f32 %v313_v63, %v290_v30  ;;  %v411_v52 = vadd.f32 %v1088_v24, %v388_v40  ;;  %v75_v63 = vld [vmem:[#allocation2 + $0x78] sm:$0xff]  ;;  %v373_v23 = vpop.permute.xlu1 %372 }
  0xf4   :  { %v206_v36 = vpop.f32.mrf.mxu0  ;;  %v295_v48 = vld [vmem:[#allocation2 + $0x30] sm:$0xff] }
  0xf5   :  { %264 = vst.msk [vmem:[#allocation2 + $0x50] sm:$0xff] %vm31_vm0, %v247_v33  ;;  %v245_v38 = vadd.f32 %v206_v36, %v68_v29  ;;  %v409_v39 = vadd.f32 %v1088_v24, %v386_v34  ;;  %v391_v58 = vmul.f32 %v338_v25, %v295_v48  ;;  %v378_v29 = vpop.permute.xlu0 %377 }
  0xf6   :  { %v843_v41 = vpop.f32.mrf.mxu0  ;;  %v293_v44 = vld [vmem:[#allocation2 + $0x20] sm:$0xff] }
  0xf7   :  { %262 = vst.msk [vmem:[#allocation2 + $0x40] sm:$0xff] %vm31_vm0, %v245_v38  ;;  %v248_v46 = vadd.f32 %v843_v41, %v71_v37  ;;  %851 = vmatmul.mubr.msk.f32.vlgmr.msra.gmra.mxu1 %vm31_vm0, %v409_v39  ;;  %v389_v47 = vmul.f32 %v328_v10, %v293_v44  ;;  %v414_v6 = vadd.f32 %v1088_v24, %v391_v58  ;;  %v383_v36 = vpop.permute.xlu1 %382 }
  0xf8   :  { %v209_v49 = vpop.f32.mrf.mxu0  ;;  %853 = vmatprep.mubr.msk.f32.mxu1 %vm31_vm0, %v410_v43  ;;  %v296_v59 = vld [vmem:[#allocation2 + $0x38] sm:$0xff] }
  0xf9   :  { %265 = vst.msk [vmem:[#allocation2 + $0x58] sm:$0xff] %vm31_vm0, %v248_v46  ;;  %v246_v51 = vadd.f32 %v209_v49, %v69_v42  ;;  %v412_v53 = vadd.f32 %v1088_v24, %v389_v47  ;;  %v392_v3 = vmul.f32 %v343_v35, %v296_v59  ;;  %v644_v42 = vpop.permute.xlu0 %643 }
  0xfa   :  { %v846_v55 = vpop.f32.mrf.mxu0  ;;  %v294_v57 = vld [vmem:[#allocation2 + $0x28] sm:$0xff] }
  0xfb   :  { %263 = vst.msk [vmem:[#allocation2 + $0x48] sm:$0xff] %vm31_vm0, %v246_v51  ;;  %v251_v60 = vadd.f32 %v846_v55, %v74_v50  ;;  %854 = vmatmul.mubr.msk.f32.gmra.mxu1 %vm31_vm0, %v411_v52  ;;  %v390_v61 = vmul.f32 %v333_v15, %v294_v57  ;;  %v415_v14 = vadd.f32 %v1088_v24, %v392_v3  ;;  %v649_v41 = vpop.permute.xlu1 %648 }
  0xfc   :  { %v222_v62 = vpop.f32.mrf.mxu0  ;;  %856 = vmatprep.mubr.msk.f32.mxu1 %vm31_vm0, %v412_v53  ;;  %v299_v10 = vld [vmem:[#allocation2 + $0x50] sm:$0xff] }
  0xfd   :  { %268 = vst.msk [vmem:[#allocation2 + $0x70] sm:$0xff] %vm31_vm0, %v251_v60  ;;  %v249_v1 = vadd.f32 %v222_v62, %v72_v56  ;;  %v413_v2 = vadd.f32 %v1088_v24, %v390_v61  ;;  %v395_v17 = vmul.f32 %v358_v0, %v299_v10  ;;  %v654_v44 = vpop.permute.xlu0 %653 }
  0xfe   :  { %v847_v4 = vpop.f32.mrf.mxu0  ;;  %v297_v7 = vld [vmem:[#allocation2 + $0x40] sm:$0xff] }
  0xff   :  { %266 = vst.msk [vmem:[#allocation2 + $0x60] sm:$0xff] %vm31_vm0, %v249_v1  ;;  %v252_v8 = vadd.f32 %v847_v4, %v75_v63  ;;  %857 = vmatmul.mubr.msk.f32.gmra.mxu1 %vm31_vm0, %v413_v2  ;;  %v393_v9 = vmul.f32 %v348_v45, %v297_v7  ;;  %v418_v25 = vadd.f32 %v1088_v24, %v395_v17  ;;  %v659_v43 = vpop.permute.xlu1 %658  ;;  %v1135_v45 = vld [vmem:[%s1223_s5] ss:$0 sm:$0xff] }
 0x100   :  { %v225_v12 = vpop.f32.mrf.mxu0  ;;  %859 = vmatprep.mubr.msk.f32.mxu1 %vm31_vm0, %v414_v6  ;;  %v300_v18 = vld [vmem:[#allocation2 + $0x58] sm:$0xff] }
 0x101   :  { %269 = vst.msk [vmem:[#allocation2 + $0x78] sm:$0xff] %vm31_vm0, %v252_v8  ;;  %v250_v13 = vadd.f32 %v225_v12, %v73_v5  ;;  %v416_v15 = vadd.f32 %v1088_v24, %v393_v9  ;;  %v396_v22 = vmul.f32 %v363_v11, %v300_v18  ;;  %v664_v49 = vpop.permute.xlu0 %663 }
 0x102   :  { %v298_v16 = vld [vmem:[#allocation2 + $0x48] sm:$0xff] }
 0x103   :  { %267 = vst.msk [vmem:[#allocation2 + $0x68] sm:$0xff] %vm31_vm0, %v250_v13  ;;  %860 = vmatmul.mubr.msk.f32.gmra.mxu1 %vm31_vm0, %v415_v14  ;;  %v394_v20 = vmul.f32 %v353_v54, %v298_v16  ;;  %v419_v30 = vadd.f32 %v1088_v24, %v396_v22  ;;  %v669_v46 = vpop.permute.xlu1 %668 }
 0x104   :  { %862 = vmatprep.mubr.msk.f32.mxu1 %vm31_vm0, %v416_v15  ;;  %v303_v28 = vld [vmem:[#allocation2 + $0x70] sm:$0xff] }
 0x105   :  { %v417_v21 = vadd.f32 %v1088_v24, %v394_v20  ;;  %v399_v33 = vmul.f32 %v378_v29, %v303_v28  ;;  %v674_v59 = vpop.permute.xlu0 %673 }
 0x106   :  { %v301_v26 = vld [vmem:[#allocation2 + $0x60] sm:$0xff] }
 0x107   :  { %863 = vmatmul.mubr.msk.f32.gmra.mxu1 %vm31_vm0, %v417_v21  ;;  %v397_v27 = vmul.f32 %v368_v19, %v301_v26  ;;  %v422_v39 = vadd.f32 %v1088_v24, %v399_v33  ;;  %v679_v55 = vpop.permute.xlu1 %678 }
 0x108   :  { %865 = vmatprep.mubr.msk.f32.mxu1 %vm31_vm0, %v418_v25  ;;  %v304_v34 = vld [vmem:[#allocation2 + $0x78] sm:$0xff] }
 0x109   :  { %v420_v31 = vadd.f32 %v1088_v24, %v397_v27  ;;  %v400_v38 = vmul.f32 %v383_v36, %v304_v34  ;;  %v684_v6 = vpop.permute.xlu0 %683 }
 0x10a   :  { %v302_v32 = vld [vmem:[#allocation2 + $0x68] sm:$0xff] }
 0x10b   :  { %866 = vmatmul.mubr.msk.f32.gmra.mxu1 %vm31_vm0, %v419_v30  ;;  %v398_v35 = vmul.f32 %v373_v23, %v302_v32  ;;  %v423_v40 = vadd.f32 %v1088_v24, %v400_v38  ;;  %v689_v2 = vpop.permute.xlu1 %688 }
 0x10c   :  { %868 = vmatprep.mubr.msk.f32.mxu1 %vm31_vm0, %v420_v31 }
 0x10d   :  { %v421_v37 = vadd.f32 %v1088_v24, %v398_v35  ;;  %v694_v17 = vpop.permute.xlu0 %693 }
 0x10f   :  { %869 = vmatmul.mubr.msk.f32.gmra.mxu1 %vm31_vm0, %v421_v37  ;;  %v699_v13 = vpop.permute.xlu1 %698 }
 0x110   :  { %871 = vmatprep.mubr.msk.f32.mxu1 %vm31_vm0, %v422_v39 }
 0x111   :  { %v704_v29 = vpop.permute.xlu0 %703 }
 0x113   :  { %872 = vmatmul.mubr.msk.f32.gmra.mxu1 %vm31_vm0, %v423_v40  ;;  %v709_v25 = vpop.permute.xlu1 %708 }
 0x115   :  { %v714_v40 = vpop.permute.xlu0 %713 }
 0x117   :  { %v719_v36 = vpop.permute.xlu1 %718 }
 0x1b7   :  { %v852_v47 = vpop.f32.mrf.mxu1 }
 0x1b8   :  { %v552_v48 = vadd.f32 %v852_v47, %v1135_v45 }
 0x1b9   :  { %v546_v50 = vpop.f32.mrf.mxu1 }
 0x1ba   :  { %v722_v51 = vmul.f32 %v649_v41, %v552_v48  ;;  %v547_v24 = vadd.f32 %v1135_v45, %v546_v50 }
 0x1bb   :  { %v855_v52 = vpop.f32.mrf.mxu1 }
 0x1bc   :  { %738 = vst.msk [vmem:[%s1224_s7 + $0x8] sm:$0xff] %vm31_vm0, %v722_v51  ;;  %v721_v53 = vmul.f32 %v644_v42, %v547_v24  ;;  %v562_v54 = vadd.f32 %v855_v52, %v1135_v45 }
 0x1bd   :  { %v556_v56 = vpop.f32.mrf.mxu1 }
 0x1be   :  { %737 = vst.msk [vmem:[%s1224_s7] sm:$0xff] %vm31_vm0, %v721_v53  ;;  %v724_v57 = vmul.f32 %v659_v43, %v562_v54  ;;  %v557_v58 = vadd.f32 %v1135_v45, %v556_v56 }
 0x1bf   :  { %v858_v60 = vpop.f32.mrf.mxu1 }
 0x1c0   :  { %740 = vst.msk [vmem:[%s1224_s7 + $0x18] sm:$0xff] %vm31_vm0, %v724_v57  ;;  %v723_v61 = vmul.f32 %v654_v44, %v557_v58  ;;  %v572_v62 = vadd.f32 %v858_v60, %v1135_v45 }
 0x1c1   :  { %v566_v63 = vpop.f32.mrf.mxu1 }
 0x1c2   :  { %739 = vst.msk [vmem:[%s1224_s7 + $0x10] sm:$0xff] %vm31_vm0, %v723_v61  ;;  %v726_v0 = vmul.f32 %v669_v46, %v572_v62  ;;  %v567_v1 = vadd.f32 %v1135_v45, %v566_v63 }
 0x1c3   :  { %v861_v3 = vpop.f32.mrf.mxu1 }
 0x1c4   :  { %742 = vst.msk [vmem:[%s1224_s7 + $0x28] sm:$0xff] %vm31_vm0, %v726_v0  ;;  %v725_v4 = vmul.f32 %v664_v49, %v567_v1  ;;  %v582_v5 = vadd.f32 %v861_v3, %v1135_v45 }
 0x1c5   :  { %v576_v7 = vpop.f32.mrf.mxu1 }
 0x1c6   :  { %741 = vst.msk [vmem:[%s1224_s7 + $0x20] sm:$0xff] %vm31_vm0, %v725_v4  ;;  %v728_v8 = vmul.f32 %v679_v55, %v582_v5  ;;  %v577_v9 = vadd.f32 %v1135_v45, %v576_v7 }
 0x1c7   :  { %v864_v10 = vpop.f32.mrf.mxu1 }
 0x1c8   :  { %744 = vst.msk [vmem:[%s1224_s7 + $0x38] sm:$0xff] %vm31_vm0, %v728_v8  ;;  %v727_v11 = vmul.f32 %v674_v59, %v577_v9  ;;  %v592_v12 = vadd.f32 %v864_v10, %v1135_v45 }
 0x1c9   :  { %v586_v14 = vpop.f32.mrf.mxu1 }
 0x1ca   :  { %743 = vst.msk [vmem:[%s1224_s7 + $0x30] sm:$0xff] %vm31_vm0, %v727_v11  ;;  %v730_v15 = vmul.f32 %v689_v2, %v592_v12  ;;  %v587_v16 = vadd.f32 %v1135_v45, %v586_v14 }
 0x1cb   :  { %v867_v18 = vpop.f32.mrf.mxu1 }
 0x1cc   :  { %746 = vst.msk [vmem:[%s1224_s7 + $0x48] sm:$0xff] %vm31_vm0, %v730_v15  ;;  %v729_v19 = vmul.f32 %v684_v6, %v587_v16  ;;  %v602_v20 = vadd.f32 %v867_v18, %v1135_v45 }
 0x1cd   :  { %v596_v21 = vpop.f32.mrf.mxu1 }
 0x1ce   :  { %745 = vst.msk [vmem:[%s1224_s7 + $0x40] sm:$0xff] %vm31_vm0, %v729_v19  ;;  %v732_v22 = vmul.f32 %v699_v13, %v602_v20  ;;  %v597_v23 = vadd.f32 %v1135_v45, %v596_v21 }
 0x1cf   :  { %v870_v26 = vpop.f32.mrf.mxu1 }
 0x1d0   :  { %748 = vst.msk [vmem:[%s1224_s7 + $0x58] sm:$0xff] %vm31_vm0, %v732_v22  ;;  %v731_v27 = vmul.f32 %v694_v17, %v597_v23  ;;  %v612_v28 = vadd.f32 %v870_v26, %v1135_v45 }
 0x1d1   :  { %v606_v30 = vpop.f32.mrf.mxu1 }
 0x1d2   :  { %747 = vst.msk [vmem:[%s1224_s7 + $0x50] sm:$0xff] %vm31_vm0, %v731_v27  ;;  %v734_v31 = vmul.f32 %v709_v25, %v612_v28  ;;  %v607_v32 = vadd.f32 %v1135_v45, %v606_v30 }
 0x1d3   :  { %v873_v33 = vpop.f32.mrf.mxu1 }
 0x1d4   :  { %750 = vst.msk [vmem:[%s1224_s7 + $0x68] sm:$0xff] %vm31_vm0, %v734_v31  ;;  %v733_v34 = vmul.f32 %v704_v29, %v607_v32  ;;  %v622_v35 = vadd.f32 %v873_v33, %v1135_v45 }
 0x1d5   :  { %v616_v37 = vpop.f32.mrf.mxu1 }
 0x1d6   :  { %749 = vst.msk [vmem:[%s1224_s7 + $0x60] sm:$0xff] %vm31_vm0, %v733_v34  ;;  %v736_v38 = vmul.f32 %v719_v36, %v622_v35  ;;  %v617_v39 = vadd.f32 %v1135_v45, %v616_v37 }
 0x1d8   :  { %752 = vst.msk [vmem:[%s1224_s7 + $0x78] sm:$0xff] %vm31_vm0, %v736_v38  ;;  %v735_v41 = vmul.f32 %v714_v40, %v617_v39 }
 0x1da   :  { %751 = vst.msk [vmem:[%s1224_s7 + $0x70] sm:$0xff] %vm31_vm0, %v735_v41 }

// kernel: test_forward.4
= control target key start
LH: loop header
LB: loop body
LE: loop exit
PB: predicated region body
PF: predicated region fallthrough
CT: control target
= control target key end

     0   :  { %v983_v1 = vmov 0   ;;  %vm31_vm0 = vcmask 64512   ;;  %v984_v45 = vmov 0.0   ;;  %vm801_vm1 = vcmask 60416   ;;  %s1314_s1 = inlined_call_operand.vmem [shape: bf16[128,8], index: 1, kind: input, shape index: {}]   ;;  %s1315_s0 = inlined_call_operand.vmem [shape: s8[128,128], index: 0, kind: input, shape index: {}]   ;;  %s1316_s2 = inlined_call_operand.vmem [shape: f32[128,1], index: 2, kind: input, shape index: {}]   ;;  %s1317_s6 = inlined_call_operand.vmem [shape: f32[128,1], index: 6, kind: input, shape index: {}]   ;;  %s1318_s4 = inlined_call_operand.vmem [shape: f32[8,8], index: 4, kind: input, shape index: {}]   ;;  %s1319_s3 = inlined_call_operand.vmem [shape: f32[1,8], index: 3, kind: input, shape index: {}]   ;;  %s1320_s5 = inlined_call_operand.vmem [shape: f32[1,8], index: 5, kind: input, shape index: {}]   ;;  %s1321_s7 = inlined_call_operand.vmem [shape: bf16[128,8], index: 7, kind: output, shape index: {}]  }
   0x1   :  { %v975_v0 = vld [vmem:[%s1314_s1 + $0x38] sm:$0xff]   ;;  %973 = vset.pattern.permute.xlu0 %v983_v1  ;;  %974 = vset.pattern.permute.xlu1 %v983_v1  ;;  %v976_v2 = vld [vmem:[%s1314_s1 + $0x30] sm:$0xff]   ;;  %v977_v3 = vld [vmem:[%s1314_s1 + $0x28] sm:$0xff]   ;;  %34 = vst.msk [vmem:[#allocation2 + $0x10] sm:$0xff] %vm31_vm0, %v984_v45 }
   0x2   :  { %913 = vmatprep.subr.bf16.mxu0 %v975_v0  ;;  %v978_v4 = vld [vmem:[%s1314_s1 + $0x20] sm:$0xff]   ;;  %v275_v8 = vld [vmem:[%s1316_s2 + $0x10] sm:$0xff]  ;;  %v274_v9 = vld [vmem:[%s1316_s2 + $0x8] sm:$0xff]  ;;  %32 = vst.msk [vmem:[#allocation2] sm:$0xff] %vm31_vm0, %v984_v45 }
   0x3   :  { %914 = vmatpush3.bf16.msra.mxu0 %v975_v0  ;;  %v48_v5 = vld [vmem:[%s1315_s0] sm:$0xff]  ;;  %317 = vperm.xlu1 %974, %v275_v8   ;;  %v276_v10 = vld [vmem:[%s1316_s2 + $0x18] sm:$0xff]  ;;  %v278_v13 = vld [vmem:[%s1316_s2 + $0x28] sm:$0xff]  ;;  %33 = vst.msk [vmem:[#allocation2 + $0x8] sm:$0xff] %vm31_vm0, %v984_v45 }
   0x4   :  { %915 = vmatprep.subr.bf16.mxu0 %v976_v2  ;;  %v52_v6 = vunpack.c.l.s8.bf16 %v48_v5  ;;  %v273_v7 = vld [vmem:[%s1316_s2] sm:$0xff]  ;;  %v979_v11 = vld [vmem:[%s1314_s1 + $0x18] sm:$0xff]   ;;  %v980_v14 = vld [vmem:[%s1314_s1 + $0x10] sm:$0xff]   ;;  %v53_v24 = vunpack.c.h.s8.bf16 %v48_v5  ;;  %35 = vst.msk [vmem:[#allocation2 + $0x18] sm:$0xff] %vm31_vm0, %v984_v45 }
   0x5   :  { %307 = vperm.xlu0 %973, %v273_v7   ;;  %v277_v12 = vld [vmem:[%s1316_s2 + $0x20] sm:$0xff]  ;;  %v279_v15 = vld [vmem:[%s1316_s2 + $0x30] sm:$0xff]  ;;  %v280_v16 = vld [vmem:[%s1316_s2 + $0x38] sm:$0xff]  ;;  %36 = vst.msk [vmem:[#allocation2 + $0x20] sm:$0xff] %vm31_vm0, %v984_v45 }
   0x6   :  { %929 = vmatprep.mubr.bf16.mxu0 %v52_v6  ;;  %v981_v17 = vld [vmem:[%s1314_s1 + $0x8] sm:$0xff]   ;;  %v281_v18 = vld [vmem:[%s1316_s2 + $0x40] sm:$0xff]  ;;  %v283_v21 = vld [vmem:[%s1316_s2 + $0x50] sm:$0xff]  ;;  %37 = vst.msk [vmem:[#allocation2 + $0x28] sm:$0xff] %vm31_vm0, %v984_v45 }
   0x7   :  { %916 = vmatpush3.bf16.msra.mxu0 %v976_v2  ;;  %322 = vperm.xlu1 %974, %v276_v10   ;;  %v282_v19 = vld [vmem:[%s1316_s2 + $0x48] sm:$0xff]  ;;  %v982_v20 = vld [vmem:[%s1314_s1] sm:$0xff]   ;;  %v284_v22 = vld [vmem:[%s1316_s2 + $0x58] sm:$0xff]  ;;  %38 = vst.msk [vmem:[#allocation2 + $0x30] sm:$0xff] %vm31_vm0, %v984_v45 }
   0x8   :  { %917 = vmatprep.subr.bf16.mxu0 %v977_v3  ;;  %v49_v23 = vld [vmem:[%s1315_s0 + $0x8] sm:$0xff]  ;;  %v285_v26 = vld [vmem:[%s1316_s2 + $0x60] sm:$0xff]  ;;  %v287_v28 = vld [vmem:[%s1316_s2 + $0x70] sm:$0xff]  ;;  %39 = vst.msk [vmem:[#allocation2 + $0x38] sm:$0xff] %vm31_vm0, %v984_v45 }
   0x9   :  { %312 = vperm.xlu0 %973, %v274_v9   ;;  %v54_v25 = vunpack.c.l.s8.bf16 %v49_v23  ;;  %v286_v27 = vld [vmem:[%s1316_s2 + $0x68] sm:$0xff]  ;;  %v50_v29 = vld [vmem:[%s1315_s0 + $0x10] sm:$0xff]  ;;  %v288_v30 = vld [vmem:[%s1316_s2 + $0x78] sm:$0xff]  ;;  %v55_v31 = vunpack.c.h.s8.bf16 %v49_v23  ;;  %40 = vst.msk [vmem:[#allocation2 + $0x40] sm:$0xff] %vm31_vm0, %v984_v45 }
   0xa   :  { %v56_v32 = vunpack.c.l.s8.bf16 %v50_v29  ;;  %v625_v33 = vld [vmem:[%s1317_s6] sm:$0xff]  ;;  %v626_v34 = vld [vmem:[%s1317_s6 + $0x8] sm:$0xff]  ;;  %v627_v35 = vld [vmem:[%s1317_s6 + $0x10] sm:$0xff]  ;;  %v57_v38 = vunpack.c.h.s8.bf16 %v50_v29  ;;  %41 = vst.msk [vmem:[#allocation2 + $0x48] sm:$0xff] %vm31_vm0, %v984_v45 }
   0xb   :  { %918 = vmatpush3.bf16.msra.mxu0 %v977_v3  ;;  %332 = vperm.xlu1 %974, %v278_v13   ;;  %v51_v36 = vld [vmem:[%s1315_s0 + $0x18] sm:$0xff]  ;;  %v629_v40 = vld [vmem:[%s1317_s6 + $0x20] sm:$0xff]  ;;  %v630_v41 = vld [vmem:[%s1317_s6 + $0x28] sm:$0xff]  ;;  %42 = vst.msk [vmem:[#allocation2 + $0x50] sm:$0xff] %vm31_vm0, %v984_v45 }
   0xc   :  { %919 = vmatprep.subr.bf16.mxu0 %v978_v4  ;;  %v628_v37 = vld [vmem:[%s1317_s6 + $0x18] sm:$0xff]  ;;  %v58_v39 = vunpack.c.l.s8.bf16 %v51_v36  ;;  %v631_v42 = vld [vmem:[%s1317_s6 + $0x30] sm:$0xff]  ;;  %v59_v44 = vunpack.c.h.s8.bf16 %v51_v36  ;;  %43 = vst.msk [vmem:[#allocation2 + $0x58] sm:$0xff] %vm31_vm0, %v984_v45  ;;  %44 = vst.msk [vmem:[#allocation2 + $0x60] sm:$0xff] %vm31_vm0, %v984_v45 }
   0xd   :  { %327 = vperm.xlu0 %973, %v277_v12   ;;  %v632_v43 = vld [vmem:[%s1317_s6 + $0x38] sm:$0xff]  ;;  %45 = vst.msk [vmem:[#allocation2 + $0x68] sm:$0xff] %vm31_vm0, %v984_v45  ;;  %46 = vst.msk [vmem:[#allocation2 + $0x70] sm:$0xff] %vm31_vm0, %v984_v45  ;;  %v633_v46 = vld [vmem:[%s1317_s6 + $0x40] sm:$0xff] }
   0xe   :  { %47 = vst.msk [vmem:[#allocation2 + $0x78] sm:$0xff] %vm31_vm0, %v984_v45  ;;  %v634_v47 = vld [vmem:[%s1317_s6 + $0x48] sm:$0xff]  ;;  %v635_v48 = vld [vmem:[%s1317_s6 + $0x50] sm:$0xff]  ;;  %v636_v49 = vld [vmem:[%s1317_s6 + $0x58] sm:$0xff] }
   0xf   :  { %920 = vmatpush3.bf16.msra.mxu0 %v978_v4  ;;  %342 = vperm.xlu1 %974, %v280_v16   ;;  %v637_v50 = vld [vmem:[%s1317_s6 + $0x60] sm:$0xff]  ;;  %v638_v51 = vld [vmem:[%s1317_s6 + $0x68] sm:$0xff]  ;;  %v639_v52 = vld [vmem:[%s1317_s6 + $0x70] sm:$0xff] }
  0x10   :  { %921 = vmatprep.subr.bf16.mxu0 %v979_v11  ;;  %v640_v53 = vld [vmem:[%s1317_s6 + $0x78] sm:$0xff]  ;;  %v424_v54 = vld [vmem:[%s1318_s4] sm:$0xff]  ;;  %v62_v56 = vld [vmem:[#allocation2 + $0x10] sm:$0xff] }
  0x11   :  { %337 = vperm.xlu0 %973, %v279_v15   ;;  %945 = vmatprep.subr.mxu1 %v424_v54  ;;  %v60_v59 = vld [vmem:[#allocation2] sm:$0xff]  ;;  %v63_v62 = vld [vmem:[#allocation2 + $0x18] sm:$0xff]  ;;  %v61_v2 = vld [vmem:[#allocation2 + $0x8] sm:$0xff] }
  0x12   :  { %946 = vmatpush3.msra.mxu1 %v424_v54  ;;  %v66_v6 = vld [vmem:[#allocation2 + $0x30] sm:$0xff]  ;;  %v64_v9 = vld [vmem:[#allocation2 + $0x20] sm:$0xff]  ;;  %v67_v13 = vld [vmem:[#allocation2 + $0x38] sm:$0xff] }
  0x13   :  { %922 = vmatpush3.bf16.msra.mxu0 %v979_v11  ;;  %352 = vperm.xlu1 %974, %v282_v19   ;;  %v70_v23 = vld [vmem:[#allocation2 + $0x50] sm:$0xff]  ;;  %v68_v29 = vld [vmem:[#allocation2 + $0x40] sm:$0xff] }
  0x14   :  { %923 = vmatprep.subr.bf16.mxu0 %v980_v14 }
  0x15   :  { %347 = vperm.xlu0 %973, %v281_v18  }
  0x17   :  { %924 = vmatpush3.bf16.msra.mxu0 %v980_v14  ;;  %362 = vperm.xlu1 %974, %v284_v22  }
  0x18   :  { %925 = vmatprep.subr.bf16.mxu0 %v981_v17 }
  0x19   :  { %357 = vperm.xlu0 %973, %v283_v21  }
  0x1b   :  { %926 = vmatpush3.bf16.msra.mxu0 %v981_v17  ;;  %372 = vperm.xlu1 %974, %v286_v27   ;;  %v65_v17 = vld [vmem:[#allocation2 + $0x28] sm:$0xff] }
  0x1c   :  { %927 = vmatprep.subr.bf16.mxu0 %v982_v20 }
  0x1d   :  { %367 = vperm.xlu0 %973, %v285_v26  }
  0x1f   :  { %928 = vmatpush3.bf16.msra.mxu0 %v982_v20  ;;  %382 = vperm.xlu1 %974, %v288_v30  }
  0x21   :  { %377 = vperm.xlu0 %973, %v287_v28  }
  0x22   :  { %930 = vmatmul.mubr.bf16.vlgmr.msra.gmra.mxu0 %v53_v24  ;;  %v1185_v24 = vld [vmem:[%s1319_s3] ss:$0 sm:$0xff] }
  0x23   :  { %933 = vmatprep.mubr.bf16.mxu0 %v54_v25  ;;  %648 = vperm.xlu1 %974, %v626_v34  }
  0x25   :  { %643 = vperm.xlu0 %973, %v625_v33  }
  0x27   :  { %658 = vperm.xlu1 %974, %v628_v37   ;;  %v71_v37 = vld [vmem:[#allocation2 + $0x58] sm:$0xff] }
  0x29   :  { %653 = vperm.xlu0 %973, %v627_v35  }
  0x2a   :  { %934 = vmatmul.mubr.bf16.gmra.mxu0 %v55_v31 }
  0x2b   :  { %937 = vmatprep.mubr.bf16.mxu0 %v56_v32  ;;  %668 = vperm.xlu1 %974, %v630_v41  }
  0x2d   :  { %663 = vperm.xlu0 %973, %v629_v40  }
  0x2f   :  { %678 = vperm.xlu1 %974, %v632_v43  }
  0x31   :  { %673 = vperm.xlu0 %973, %v631_v42   ;;  %v69_v42 = vld [vmem:[#allocation2 + $0x48] sm:$0xff] }
  0x32   :  { %938 = vmatmul.mubr.bf16.gmra.mxu0 %v57_v38 }
  0x33   :  { %941 = vmatprep.mubr.bf16.mxu0 %v58_v39  ;;  %688 = vperm.xlu1 %974, %v634_v47  }
  0x35   :  { %683 = vperm.xlu0 %973, %v633_v46  }
  0x37   :  { %698 = vperm.xlu1 %974, %v636_v49  }
  0x39   :  { %693 = vperm.xlu0 %973, %v635_v48  }
  0x3a   :  { %942 = vmatmul.mubr.bf16.gmra.mxu0 %v59_v44 }
  0x3b   :  { %708 = vperm.xlu1 %974, %v638_v51  }
  0x3d   :  { %703 = vperm.xlu0 %973, %v637_v50   ;;  %v74_v50 = vld [vmem:[#allocation2 + $0x70] sm:$0xff] }
  0x3f   :  { %718 = vperm.xlu1 %974, %v640_v53  }
  0x41   :  { %713 = vperm.xlu0 %973, %v639_v52  }
  0x7e   :  { %v318_v57 = vpop.permute.xlu1 %317 }
  0x80   :  { %v308_v55 = vpop.permute.xlu0 %307 }
  0x82   :  { %v323_v4 = vpop.permute.xlu1 %322 }
  0x84   :  { %v313_v63 = vpop.permute.xlu0 %312 }
  0x86   :  { %v333_v15 = vpop.permute.xlu1 %332 }
  0x88   :  { %v328_v10 = vpop.permute.xlu0 %327 }
  0x8a   :  { %v343_v35 = vpop.permute.xlu1 %342 }
  0x8c   :  { %v338_v25 = vpop.permute.xlu0 %337 }
  0x8e   :  { %v353_v54 = vpop.permute.xlu1 %352 }
  0x90   :  { %v348_v45 = vpop.permute.xlu0 %347 }
  0xe2   :  { %v931_v58 = vpop.f32.mrf.mxu0 }
  0xe3   :  { %v239_v60 = vadd.f32 %v931_v58, %v62_v56  ;;  %v72_v56 = vld [vmem:[#allocation2 + $0x60] sm:$0xff] }
  0xe4   :  { %v174_v61 = vpop.f32.mrf.mxu0 }
  0xe5   :  { %256 = vst.msk [vmem:[#allocation2 + $0x10] sm:$0xff] %vm31_vm0, %v239_v60  ;;  %v237_v0 = vadd.f32 %v174_v61, %v60_v59 }
  0xe6   :  { %v932_v1 = vpop.f32.mrf.mxu0 }
  0xe7   :  { %254 = vst.msk [vmem:[#allocation2] sm:$0xff] %vm31_vm0, %v237_v0  ;;  %v240_v3 = vadd.f32 %v932_v1, %v63_v62  ;;  %v358_v0 = vpop.permute.xlu0 %357 }
  0xe8   :  { %v177_v5 = vpop.f32.mrf.mxu0 }
  0xe9   :  { %257 = vst.msk [vmem:[#allocation2 + $0x18] sm:$0xff] %vm31_vm0, %v240_v3  ;;  %v238_v7 = vadd.f32 %v177_v5, %v61_v2  ;;  %v73_v5 = vld [vmem:[#allocation2 + $0x68] sm:$0xff] }
  0xea   :  { %v935_v8 = vpop.f32.mrf.mxu0 }
  0xeb   :  { %255 = vst.msk [vmem:[#allocation2 + $0x8] sm:$0xff] %vm31_vm0, %v238_v7  ;;  %v243_v11 = vadd.f32 %v935_v8, %v66_v6 }
  0xec   :  { %v190_v12 = vpop.f32.mrf.mxu0  ;;  %v291_v21 = vld [vmem:[#allocation2 + $0x10] sm:$0xff] }
  0xed   :  { %260 = vst.msk [vmem:[#allocation2 + $0x30] sm:$0xff] %vm31_vm0, %v243_v11  ;;  %v241_v14 = vadd.f32 %v190_v12, %v64_v9  ;;  %v387_v31 = vmul.f32 %v318_v57, %v291_v21  ;;  %v363_v11 = vpop.permute.xlu1 %362 }
  0xee   :  { %v936_v16 = vpop.f32.mrf.mxu0  ;;  %v289_v18 = vld [vmem:[#allocation2] sm:$0xff] }
  0xef   :  { %258 = vst.msk [vmem:[#allocation2 + $0x20] sm:$0xff] %vm31_vm0, %v241_v14  ;;  %v244_v19 = vadd.f32 %v936_v16, %v67_v13  ;;  %v385_v20 = vmul.f32 %v308_v55, %v289_v18  ;;  %v410_v43 = vadd.f32 %v1185_v24, %v387_v31 }
  0xf0   :  { %v193_v22 = vpop.f32.mrf.mxu0  ;;  %v292_v32 = vld [vmem:[#allocation2 + $0x18] sm:$0xff] }
  0xf1   :  { %261 = vst.msk [vmem:[#allocation2 + $0x38] sm:$0xff] %vm31_vm0, %v244_v19  ;;  %v242_v26 = vadd.f32 %v193_v22, %v65_v17  ;;  %v408_v27 = vadd.f32 %v1185_v24, %v385_v20  ;;  %v388_v40 = vmul.f32 %v323_v4, %v292_v32  ;;  %v368_v19 = vpop.permute.xlu0 %367 }
  0xf2   :  { %v939_v28 = vpop.f32.mrf.mxu0  ;;  %v290_v30 = vld [vmem:[#allocation2 + $0x8] sm:$0xff] }
  0xf3   :  { %259 = vst.msk [vmem:[#allocation2 + $0x28] sm:$0xff] %vm31_vm0, %v242_v26  ;;  %v247_v33 = vadd.f32 %v939_v28, %v70_v23  ;;  %947 = vmatprep.mubr.msk.f32.mxu1 %vm31_vm0, %v408_v27  ;;  %v386_v34 = vmul.f32 %v313_v63, %v290_v30  ;;  %v411_v52 = vadd.f32 %v1185_v24, %v388_v40  ;;  %v75_v63 = vld [vmem:[#allocation2 + $0x78] sm:$0xff]  ;;  %v373_v23 = vpop.permute.xlu1 %372 }
  0xf4   :  { %v206_v36 = vpop.f32.mrf.mxu0  ;;  %v295_v48 = vld [vmem:[#allocation2 + $0x30] sm:$0xff] }
  0xf5   :  { %264 = vst.msk [vmem:[#allocation2 + $0x50] sm:$0xff] %vm31_vm0, %v247_v33  ;;  %v245_v38 = vadd.f32 %v206_v36, %v68_v29  ;;  %v409_v39 = vadd.f32 %v1185_v24, %v386_v34  ;;  %v391_v58 = vmul.f32 %v338_v25, %v295_v48  ;;  %v378_v29 = vpop.permute.xlu0 %377 }
  0xf6   :  { %v940_v41 = vpop.f32.mrf.mxu0  ;;  %v293_v44 = vld [vmem:[#allocation2 + $0x20] sm:$0xff] }
  0xf7   :  { %262 = vst.msk [vmem:[#allocation2 + $0x40] sm:$0xff] %vm31_vm0, %v245_v38  ;;  %v248_v46 = vadd.f32 %v940_v41, %v71_v37  ;;  %948 = vmatmul.mubr.msk.f32.vlgmr.msra.gmra.mxu1 %vm31_vm0, %v409_v39  ;;  %v389_v47 = vmul.f32 %v328_v10, %v293_v44  ;;  %v414_v6 = vadd.f32 %v1185_v24, %v391_v58  ;;  %v383_v36 = vpop.permute.xlu1 %382 }
  0xf8   :  { %v209_v49 = vpop.f32.mrf.mxu0  ;;  %950 = vmatprep.mubr.msk.f32.mxu1 %vm31_vm0, %v410_v43  ;;  %v296_v59 = vld [vmem:[#allocation2 + $0x38] sm:$0xff] }
  0xf9   :  { %265 = vst.msk [vmem:[#allocation2 + $0x58] sm:$0xff] %vm31_vm0, %v248_v46  ;;  %v246_v51 = vadd.f32 %v209_v49, %v69_v42  ;;  %v412_v53 = vadd.f32 %v1185_v24, %v389_v47  ;;  %v392_v3 = vmul.f32 %v343_v35, %v296_v59  ;;  %v644_v42 = vpop.permute.xlu0 %643 }
  0xfa   :  { %v943_v55 = vpop.f32.mrf.mxu0  ;;  %v294_v57 = vld [vmem:[#allocation2 + $0x28] sm:$0xff] }
  0xfb   :  { %263 = vst.msk [vmem:[#allocation2 + $0x48] sm:$0xff] %vm31_vm0, %v246_v51  ;;  %v251_v60 = vadd.f32 %v943_v55, %v74_v50  ;;  %951 = vmatmul.mubr.msk.f32.gmra.mxu1 %vm31_vm0, %v411_v52  ;;  %v390_v61 = vmul.f32 %v333_v15, %v294_v57  ;;  %v415_v14 = vadd.f32 %v1185_v24, %v392_v3  ;;  %v649_v41 = vpop.permute.xlu1 %648 }
  0xfc   :  { %v222_v62 = vpop.f32.mrf.mxu0  ;;  %953 = vmatprep.mubr.msk.f32.mxu1 %vm31_vm0, %v412_v53  ;;  %v299_v10 = vld [vmem:[#allocation2 + $0x50] sm:$0xff] }
  0xfd   :  { %268 = vst.msk [vmem:[#allocation2 + $0x70] sm:$0xff] %vm31_vm0, %v251_v60  ;;  %v249_v1 = vadd.f32 %v222_v62, %v72_v56  ;;  %v413_v2 = vadd.f32 %v1185_v24, %v390_v61  ;;  %v395_v17 = vmul.f32 %v358_v0, %v299_v10  ;;  %v654_v44 = vpop.permute.xlu0 %653 }
  0xfe   :  { %v944_v4 = vpop.f32.mrf.mxu0  ;;  %v297_v7 = vld [vmem:[#allocation2 + $0x40] sm:$0xff] }
  0xff   :  { %266 = vst.msk [vmem:[#allocation2 + $0x60] sm:$0xff] %vm31_vm0, %v249_v1  ;;  %v252_v8 = vadd.f32 %v944_v4, %v75_v63  ;;  %954 = vmatmul.mubr.msk.f32.gmra.mxu1 %vm31_vm0, %v413_v2  ;;  %v393_v9 = vmul.f32 %v348_v45, %v297_v7  ;;  %v418_v25 = vadd.f32 %v1185_v24, %v395_v17  ;;  %v659_v43 = vpop.permute.xlu1 %658  ;;  %v1232_v45 = vld [vmem:[%s1320_s5] ss:$0 sm:$0xff] }
 0x100   :  { %v225_v12 = vpop.f32.mrf.mxu0  ;;  %956 = vmatprep.mubr.msk.f32.mxu1 %vm31_vm0, %v414_v6  ;;  %v300_v18 = vld [vmem:[#allocation2 + $0x58] sm:$0xff] }
 0x101   :  { %269 = vst.msk [vmem:[#allocation2 + $0x78] sm:$0xff] %vm31_vm0, %v252_v8  ;;  %v250_v13 = vadd.f32 %v225_v12, %v73_v5  ;;  %v416_v15 = vadd.f32 %v1185_v24, %v393_v9  ;;  %v396_v22 = vmul.f32 %v363_v11, %v300_v18  ;;  %v664_v49 = vpop.permute.xlu0 %663 }
 0x102   :  { %v298_v16 = vld [vmem:[#allocation2 + $0x48] sm:$0xff] }
 0x103   :  { %267 = vst.msk [vmem:[#allocation2 + $0x68] sm:$0xff] %vm31_vm0, %v250_v13  ;;  %957 = vmatmul.mubr.msk.f32.gmra.mxu1 %vm31_vm0, %v415_v14  ;;  %v394_v20 = vmul.f32 %v353_v54, %v298_v16  ;;  %v419_v30 = vadd.f32 %v1185_v24, %v396_v22  ;;  %v669_v46 = vpop.permute.xlu1 %668 }
 0x104   :  { %959 = vmatprep.mubr.msk.f32.mxu1 %vm31_vm0, %v416_v15  ;;  %v303_v28 = vld [vmem:[#allocation2 + $0x70] sm:$0xff] }
 0x105   :  { %v417_v21 = vadd.f32 %v1185_v24, %v394_v20  ;;  %v399_v33 = vmul.f32 %v378_v29, %v303_v28  ;;  %v674_v61 = vpop.permute.xlu0 %673 }
 0x106   :  { %v301_v26 = vld [vmem:[#allocation2 + $0x60] sm:$0xff] }
 0x107   :  { %960 = vmatmul.mubr.msk.f32.gmra.mxu1 %vm31_vm0, %v417_v21  ;;  %v397_v27 = vmul.f32 %v368_v19, %v301_v26  ;;  %v422_v39 = vadd.f32 %v1185_v24, %v399_v33  ;;  %v679_v56 = vpop.permute.xlu1 %678 }
 0x108   :  { %962 = vmatprep.mubr.msk.f32.mxu1 %vm31_vm0, %v418_v25  ;;  %v304_v34 = vld [vmem:[#allocation2 + $0x78] sm:$0xff] }
 0x109   :  { %v420_v31 = vadd.f32 %v1185_v24, %v397_v27  ;;  %v400_v38 = vmul.f32 %v383_v36, %v304_v34  ;;  %v684_v11 = vpop.permute.xlu0 %683 }
 0x10a   :  { %v302_v32 = vld [vmem:[#allocation2 + $0x68] sm:$0xff] }
 0x10b   :  { %963 = vmatmul.mubr.msk.f32.gmra.mxu1 %vm31_vm0, %v419_v30  ;;  %v398_v35 = vmul.f32 %v373_v23, %v302_v32  ;;  %v423_v40 = vadd.f32 %v1185_v24, %v400_v38  ;;  %v689_v6 = vpop.permute.xlu1 %688 }
 0x10c   :  { %965 = vmatprep.mubr.msk.f32.mxu1 %vm31_vm0, %v420_v31 }
 0x10d   :  { %v421_v37 = vadd.f32 %v1185_v24, %v398_v35  ;;  %v694_v26 = vpop.permute.xlu0 %693 }
 0x10f   :  { %966 = vmatmul.mubr.msk.f32.gmra.mxu1 %vm31_vm0, %v421_v37  ;;  %v699_v20 = vpop.permute.xlu1 %698 }
 0x110   :  { %968 = vmatprep.mubr.msk.f32.mxu1 %vm31_vm0, %v422_v39 }
 0x113   :  { %969 = vmatmul.mubr.msk.f32.gmra.mxu1 %vm31_vm0, %v423_v40  ;;  %v709_v35 = vpop.permute.xlu1 %708  ;;  %v704_v40 = vpop.permute.xlu0 %703 }
 0x1b7   :  { %v949_v47 = vpop.f32.mrf.mxu1 }
 0x1b8   :  { %v552_v48 = vadd.f32 %v949_v47, %v1232_v45 }
 0x1b9   :  { %v546_v50 = vpop.f32.mrf.mxu1 }
 0x1ba   :  { %v722_v51 = vmul.f32 %v649_v41, %v552_v48  ;;  %v547_v24 = vadd.f32 %v1232_v45, %v546_v50  ;;  %v719_v50 = vpop.permute.xlu1 %718 }
 0x1bb   :  { %v952_v52 = vpop.f32.mrf.mxu1 }
 0x1bc   :  { %v865_v53 = vpack.c.bf16 %v722_v51, %v722_v51  ;;  %v721_v54 = vmul.f32 %v644_v42, %v547_v24  ;;  %v562_v55 = vadd.f32 %v952_v52, %v1232_v45 }
 0x1bd   :  { %v556_v57 = vpop.f32.mrf.mxu1 }
 0x1be   :  { %803 = vst.msk [vmem:[%s1321_s7 + $0x4] sm:$0xf] %vm801_vm1, %v865_v53  ;;  %v864_v58 = vpack.c.bf16 %v721_v54, %v721_v54  ;;  %v724_v59 = vmul.f32 %v659_v43, %v562_v55  ;;  %v557_v60 = vadd.f32 %v1232_v45, %v556_v57  ;;  %v714_v54 = vpop.permute.xlu0 %713 }
 0x1bf   :  { %v955_v62 = vpop.f32.mrf.mxu1 }
 0x1c0   :  { %802 = vst.msk [vmem:[%s1321_s7] sm:$0xf] %vm801_vm1, %v864_v58  ;;  %v867_v63 = vpack.c.bf16 %v724_v59, %v724_v59  ;;  %v723_v0 = vmul.f32 %v654_v44, %v557_v60  ;;  %v572_v1 = vadd.f32 %v955_v62, %v1232_v45 }
 0x1c1   :  { %v566_v2 = vpop.f32.mrf.mxu1 }
 0x1c2   :  { %805 = vst.msk [vmem:[%s1321_s7 + $0xc] sm:$0xf] %vm801_vm1, %v867_v63  ;;  %v866_v3 = vpack.c.bf16 %v723_v0, %v723_v0  ;;  %v726_v4 = vmul.f32 %v669_v46, %v572_v1  ;;  %v567_v5 = vadd.f32 %v1232_v45, %v566_v2 }
 0x1c3   :  { %v958_v7 = vpop.f32.mrf.mxu1 }
 0x1c4   :  { %804 = vst.msk [vmem:[%s1321_s7 + $0x8] sm:$0xf] %vm801_vm1, %v866_v3  ;;  %v869_v8 = vpack.c.bf16 %v726_v4, %v726_v4  ;;  %v725_v9 = vmul.f32 %v664_v49, %v567_v5  ;;  %v582_v10 = vadd.f32 %v958_v7, %v1232_v45 }
 0x1c5   :  { %v576_v12 = vpop.f32.mrf.mxu1 }
 0x1c6   :  { %807 = vst.msk [vmem:[%s1321_s7 + $0x14] sm:$0xf] %vm801_vm1, %v869_v8  ;;  %v868_v13 = vpack.c.bf16 %v725_v9, %v725_v9  ;;  %v728_v14 = vmul.f32 %v679_v56, %v582_v10  ;;  %v577_v15 = vadd.f32 %v1232_v45, %v576_v12 }
 0x1c7   :  { %v961_v16 = vpop.f32.mrf.mxu1 }
 0x1c8   :  { %806 = vst.msk [vmem:[%s1321_s7 + $0x10] sm:$0xf] %vm801_vm1, %v868_v13  ;;  %v871_v17 = vpack.c.bf16 %v728_v14, %v728_v14  ;;  %v727_v18 = vmul.f32 %v674_v61, %v577_v15  ;;  %v592_v19 = vadd.f32 %v961_v16, %v1232_v45 }
 0x1c9   :  { %v586_v21 = vpop.f32.mrf.mxu1 }
 0x1ca   :  { %809 = vst.msk [vmem:[%s1321_s7 + $0x1c] sm:$0xf] %vm801_vm1, %v871_v17  ;;  %v870_v22 = vpack.c.bf16 %v727_v18, %v727_v18  ;;  %v730_v23 = vmul.f32 %v689_v6, %v592_v19  ;;  %v587_v25 = vadd.f32 %v1232_v45, %v586_v21 }
 0x1cb   :  { %v964_v27 = vpop.f32.mrf.mxu1 }
 0x1cc   :  { %808 = vst.msk [vmem:[%s1321_s7 + $0x18] sm:$0xf] %vm801_vm1, %v870_v22  ;;  %v873_v28 = vpack.c.bf16 %v730_v23, %v730_v23  ;;  %v729_v29 = vmul.f32 %v684_v11, %v587_v25  ;;  %v602_v30 = vadd.f32 %v964_v27, %v1232_v45 }
 0x1cd   :  { %v596_v31 = vpop.f32.mrf.mxu1 }
 0x1ce   :  { %811 = vst.msk [vmem:[%s1321_s7 + $0x24] sm:$0xf] %vm801_vm1, %v873_v28  ;;  %v872_v32 = vpack.c.bf16 %v729_v29, %v729_v29  ;;  %v732_v33 = vmul.f32 %v699_v20, %v602_v30  ;;  %v597_v34 = vadd.f32 %v1232_v45, %v596_v31 }
 0x1cf   :  { %v967_v36 = vpop.f32.mrf.mxu1 }
 0x1d0   :  { %810 = vst.msk [vmem:[%s1321_s7 + $0x20] sm:$0xf] %vm801_vm1, %v872_v32  ;;  %v875_v37 = vpack.c.bf16 %v732_v33, %v732_v33  ;;  %v731_v38 = vmul.f32 %v694_v26, %v597_v34  ;;  %v612_v39 = vadd.f32 %v967_v36, %v1232_v45 }
 0x1d1   :  { %v606_v41 = vpop.f32.mrf.mxu1 }
 0x1d2   :  { %813 = vst.msk [vmem:[%s1321_s7 + $0x2c] sm:$0xf] %vm801_vm1, %v875_v37  ;;  %v874_v42 = vpack.c.bf16 %v731_v38, %v731_v38  ;;  %v734_v43 = vmul.f32 %v709_v35, %v612_v39  ;;  %v607_v44 = vadd.f32 %v1232_v45, %v606_v41 }
 0x1d3   :  { %v970_v46 = vpop.f32.mrf.mxu1 }
 0x1d4   :  { %812 = vst.msk [vmem:[%s1321_s7 + $0x28] sm:$0xf] %vm801_vm1, %v874_v42  ;;  %v877_v47 = vpack.c.bf16 %v734_v43, %v734_v43  ;;  %v733_v48 = vmul.f32 %v704_v40, %v607_v44  ;;  %v622_v49 = vadd.f32 %v970_v46, %v1232_v45 }
 0x1d5   :  { %v616_v51 = vpop.f32.mrf.mxu1 }
 0x1d6   :  { %815 = vst.msk [vmem:[%s1321_s7 + $0x34] sm:$0xf] %vm801_vm1, %v877_v47  ;;  %v876_v24 = vpack.c.bf16 %v733_v48, %v733_v48  ;;  %v736_v52 = vmul.f32 %v719_v50, %v622_v49  ;;  %v617_v53 = vadd.f32 %v1232_v45, %v616_v51 }
 0x1d8   :  { %814 = vst.msk [vmem:[%s1321_s7 + $0x30] sm:$0xf] %vm801_vm1, %v876_v24  ;;  %v879_v55 = vpack.c.bf16 %v736_v52, %v736_v52  ;;  %v735_v56 = vmul.f32 %v714_v54, %v617_v53 }
 0x1da   :  { %817 = vst.msk [vmem:[%s1321_s7 + $0x3c] sm:$0xf] %vm801_vm1, %v879_v55  ;;  %v878_v57 = vpack.c.bf16 %v735_v56, %v735_v56 }
 0x1dc   :  { %816 = vst.msk [vmem:[%s1321_s7 + $0x38] sm:$0xf] %vm801_vm1, %v878_v57 }

</bundles_post_ra>
